<compile_context>
chip_gen: v5e
topology: v5e:2x2
jax: 0.10.0
libtpu: 0.0.40
codegen_flags: <defaults>
</compile_context>

<pallas_src>
import functools

import jax
import jax.numpy as jnp
from jax.experimental import pallas as pl
from jax.experimental.pallas import tpu as pltpu


def _score_kernel(x_ref, w_ref, p_ref, mask_ref, b_ref, o_ref, *,
                  normalization, add_bias):
    # x_ref:    (BLK, M, F)   VMEM  flat node features (raw, unsliced)
    # w_ref:    (F, n2)       VMEM  weight column broadcast over n2 lanes (1/T folded)
    # p_ref:    (n1, M)       VMEM  one-hot gather matrix  P[i,k] = 1{k%n1==i, k<n1*n2}
    # mask_ref: (M, n2)       VMEM  column mask            Mask[k,j] = 1{k//n1==j, k<n1*n2}
    # b_ref:    (1,)          SMEM  scalar bias (1/T folded for sigmoid); unused for softmax
    # o_ref:    (BLK, n1, n2) VMEM  f32 output block
    blk, m, f = x_ref.shape
    n1 = p_ref.shape[0]
    n2 = w_ref.shape[1]

    # One MXU push for the whole batch block (leading-dim merge is layout-free).
    x = x_ref[...].reshape(blk * m, f).astype(jnp.float32)
    sw = jnp.dot(x, w_ref[...], preferred_element_type=jnp.float32)   # (BLK*M, n2)

    # Zero out every column j != k // n1 (and every row k >= n1*n2).
    t = sw.reshape(blk, m, n2) * mask_ref[...]                        # (BLK, M, n2)

    # Gather:  out[b, i, j] = s[b, j*n1 + i]  via  P @ (masked scores).
    p = p_ref[...]
    rows = [jnp.dot(p, t[b], preferred_element_type=jnp.float32)      # (n1, n2) each
            for b in range(blk)]
    s = jnp.stack(rows, axis=0)                                        # (BLK, n1, n2)

    if add_bias:                      # sigmoid / none paths only
        s = s + b_ref[0]

    if normalization == "softmax":
        mx = jnp.max(s, axis=-1, keepdims=True)
        e = jnp.exp(s - mx)
        out = e / jnp.sum(e, axis=-1, keepdims=True)    # exact normalization
    elif normalization == "sigmoid":
        out = 1.0 / (1.0 + jnp.exp(-s))
    else:  # "none"
        out = s

    o_ref[...] = out.astype(o_ref.dtype)                # single dense block store


def _batch_block(b, cap=16):
    """Largest divisor of b that is <= cap (keeps x block well under VMEM limits,
    including v7x's 32 MiB scoped default)."""
    blk = min(b, cap)
    while b % blk:
        blk -= 1
    return blk


def score_layer_forward_batched(x, weight, bias, n1, n2, *, temperature=1.0,
                                normalization="softmax"):
    """Batched ScoreLayer forward.

    x:      (B, max_size**2, in_feat)  (or (max_size**2, in_feat) for B=1)
    weight: (1, in_feat)   bias: (1,)
    n1, n2: static Python ints.  Returns (B, n1, n2) float32.
    """
    if x.ndim == 2:
        x = x[None]
    B, M, in_feat = x.shape
    assert 1 <= n1 * n2 <= M, "n1*n2 must fit inside max_size**2"

    if normalization == "sinkhorn":
        # TODO(synk): pygm.sinkhorn normalization has no Pallas implementation.
        raise NotImplementedError("sinkhorn normalization is not implemented")
    if normalization not in ("softmax", "sigmoid", "none"):
        raise ValueError(f"unsupported normalization: {normalization}")

    inv_t = float(1.0 / temperature)
    add_bias = normalization != "softmax"       # softmax is shift-invariant in b
    w_eff = weight.reshape(in_feat, 1).astype(jnp.float32)
    b_eff = bias.reshape(1).astype(jnp.float32)
    if normalization in ("softmax", "sigmoid") and inv_t != 1.0:
        w_eff = w_eff * inv_t                   # fold 1/T into the 32-elem weight
        b_eff = b_eff * inv_t
    w_wide = jnp.tile(w_eff, (1, n2))           # (F, n2)

    # Constant gather / mask matrices (built once; ~12 KiB + ~16 KiB).
    k = jnp.arange(M)
    valid = k < n1 * n2
    mask = (((k[:, None] // n1) == jnp.arange(n2)[None, :]) & valid[:, None]
            ).astype(jnp.float32)                                    # (M, n2)
    p_mat = (((k[None, :] % n1) == jnp.arange(n1)[:, None]) & valid[None, :]
             ).astype(jnp.float32)                                   # (n1, M)

    blk = _batch_block(B)
    kernel = functools.partial(_score_kernel, normalization=normalization,
                               add_bias=add_bias)

    return pl.pallas_call(
        kernel,
        out_shape=jax.ShapeDtypeStruct((B, n1, n2), jnp.float32),
        grid=(B // blk,),
        in_specs=[
            pl.BlockSpec((blk, M, in_feat), lambda g: (g, 0, 0)),    # raw flat x
            pl.BlockSpec((in_feat, n2), lambda g: (0, 0)),           # W_wide
            pl.BlockSpec((n1, M), lambda g: (0, 0)),                 # P one-hot
            pl.BlockSpec((M, n2), lambda g: (0, 0)),                 # Mask
            pl.BlockSpec(memory_space=pltpu.MemorySpace.SMEM),       # bias scalar
        ],
        out_specs=pl.BlockSpec((blk, n1, n2), lambda g: (g, 0, 0)),
        compiler_params=pltpu.CompilerParams(
            dimension_semantics=("parallel",)),                      # v7x: 2 TCs
    )(x, w_wide, p_mat, mask, b_eff)


def score_layer_forward(x, weight, bias, n1, n2, *, temperature=1.0,
                        normalization="softmax"):
    """Single-instance path matching ScoreLayer.forward exactly: (n1, n2)."""
    return score_layer_forward_batched(
        x, weight, bias, n1, n2,
        temperature=temperature, normalization=normalization)[0]


def _reference(x2d, weight, bias, n1, n2, temperature=1.0,
               normalization="softmax"):
    xv = x2d[: n1 * n2]
    s = xv @ weight.T + bias                 # (n1*n2, 1)
    S = s.reshape(n2, n1).T                  # (n1, n2)
    if normalization == "softmax":
        return jax.nn.softmax(S / temperature, axis=-1)
    if normalization == "sigmoid":
        return jax.nn.sigmoid(S / temperature)
    return S


if __name__ == "__main__":
    # Small shapes consistent with the module: in_feat=32, max_size=16.
    in_feat = 32
    max_size = 16
    n1, n2 = 12, 16                          # n1*n2 = 192 <= max_size**2 = 256
    B = 4                                    # 4 ScoreLayer instances, one call

    key = jax.random.PRNGKey(0)
    kx, kw, kb = jax.random.split(key, 3)

    x = jax.random.normal(kx, (B, max_size * max_size, in_feat),
                          dtype=jnp.float32)

    # Deterministic Linear(in_feat, 1) init (PyTorch-style uniform +-1/sqrt(F)).
    bound = 1.0 / jnp.sqrt(jnp.float32(in_feat))
    weight = jax.random.uniform(kw, (1, in_feat), jnp.float32, -bound, bound)
    bias = jax.random.uniform(kb, (1,), jnp.float32, -bound, bound)

    # --- softmax path (module default) ---
    out = score_layer_forward_batched(x, weight, bias, n1, n2,
                                      temperature=1.0, normalization="softmax")
    out = jax.block_until_ready(out)
    assert out.shape == (B, n1, n2)
    ref = jnp.stack([_reference(x[i], weight, bias, n1, n2) for i in range(B)])
    assert jnp.allclose(out, ref, rtol=5e-3, atol=1e-3), "softmax mismatch"
    assert jnp.allclose(jnp.sum(out, axis=-1), 1.0, atol=2e-3), "rows !~ 1"

    # --- sigmoid path with temperature (exercises bias / 1/T folding) ---
    out_sig = jax.block_until_ready(score_layer_forward_batched(
        x, weight, bias, n1, n2, temperature=2.0, normalization="sigmoid"))
    ref_sig = jnp.stack([_reference(x[i], weight, bias, n1, n2, 2.0, "sigmoid")
                         for i in range(B)])
    assert jnp.allclose(out_sig, ref_sig, rtol=5e-3, atol=1e-3), "sigmoid mismatch"

    # --- single-instance path (module-equivalent signature) ---
    out1 = jax.block_until_ready(score_layer_forward(x[0], weight, bias, n1, n2))
    assert out1.shape == (n1, n2)
    assert jnp.allclose(out1, ref[0], rtol=5e-3, atol=1e-3), "single mismatch"

    print("KERNEL_OK")
</pallas_src>

<mosaic_0001>
module attributes {stable_mosaic.version = 11 : i64} {
  func.func @_score_kernel(%arg0: i32, %arg1: memref<4x256x32xf32, #tpu.memory_space<vmem>>, %arg2: memref<32x16xf32, #tpu.memory_space<vmem>>, %arg3: memref<12x256xf32, #tpu.memory_space<vmem>>, %arg4: memref<256x16xf32, #tpu.memory_space<vmem>>, %arg5: memref<1xf32, #tpu.memory_space<smem>>, %arg6: memref<4x12x16xf32, #tpu.memory_space<vmem>>) attributes {dimension_semantics = [#tpu.dimension_semantics<parallel>], iteration_bounds = array<i64: 1>, scalar_prefetch = 0 : i64, scratch_operands = 0 : i64, tpu.core_type = #tpu.core_type<tc>, window_params = [{transform_indices = @transform_0, window_bounds = array<i64: 4, 256, 32>}, {pipeline_mode = #tpu.pipeline_mode<synchronous>, transform_indices = @transform_1, window_bounds = array<i64: 32, 16>}, {pipeline_mode = #tpu.pipeline_mode<synchronous>, transform_indices = @transform_2, window_bounds = array<i64: 12, 256>}, {pipeline_mode = #tpu.pipeline_mode<synchronous>, transform_indices = @transform_3, window_bounds = array<i64: 256, 16>}, {transform_indices = @transform_4, window_bounds = array<i64: 1>}, {transform_indices = @transform_5, window_bounds = array<i64: 4, 12, 16>}]} {
    %c0 = arith.constant 0 : index
    %c0_0 = arith.constant 0 : index
    %c0_1 = arith.constant 0 : index
    %0 = vector.load %arg1[%c0, %c0_0, %c0_1] : memref<4x256x32xf32, #tpu.memory_space<vmem>>, vector<4x256x32xf32>
    %1 = vector.shape_cast %0 : vector<4x256x32xf32> to vector<1024x32xf32>
    %c0_2 = arith.constant 0 : index
    %c0_3 = arith.constant 0 : index
    %2 = vector.load %arg2[%c0_2, %c0_3] : memref<32x16xf32, #tpu.memory_space<vmem>>, vector<32x16xf32>
    %cst = arith.constant dense<0.000000e+00> : vector<1024x16xf32>
    %3 = tpu.matmul %1, %2, %cst {dimension_numbers = #tpu.dot_dimension_numbers<[1], [0], [0], [1], [0, 0, 1, 1], [], []>} : vector<1024x32xf32>, vector<32x16xf32>, vector<1024x16xf32> -> vector<1024x16xf32>
    %4 = vector.shape_cast %3 : vector<1024x16xf32> to vector<4x256x16xf32>
    %c0_4 = arith.constant 0 : index
    %c0_5 = arith.constant 0 : index
    %5 = vector.load %arg4[%c0_4, %c0_5] : memref<256x16xf32, #tpu.memory_space<vmem>>, vector<256x16xf32>
    %6 = vector.shape_cast %5 : vector<256x16xf32> to vector<1x256x16xf32>
    %7 = vector.broadcast %6 : vector<1x256x16xf32> to vector<4x256x16xf32>
    %8 = arith.mulf %4, %7 : vector<4x256x16xf32>
    %c0_6 = arith.constant 0 : index
    %c0_7 = arith.constant 0 : index
    %9 = vector.load %arg3[%c0_6, %c0_7] : memref<12x256xf32, #tpu.memory_space<vmem>>, vector<12x256xf32>
    %10 = vector.extract_strided_slice %8 {offsets = [0, 0, 0], sizes = [1, 256, 16], strides = [1, 1, 1]} : vector<4x256x16xf32> to vector<1x256x16xf32>
    %11 = vector.shape_cast %10 : vector<1x256x16xf32> to vector<256x16xf32>
    %cst_8 = arith.constant dense<0.000000e+00> : vector<12x16xf32>
    %12 = tpu.matmul %9, %11, %cst_8 {dimension_numbers = #tpu.dot_dimension_numbers<[1], [0], [0], [1], [0, 0, 1, 1], [], []>} : vector<12x256xf32>, vector<256x16xf32>, vector<12x16xf32> -> vector<12x16xf32>
    %13 = vector.extract_strided_slice %8 {offsets = [1, 0, 0], sizes = [1, 256, 16], strides = [1, 1, 1]} : vector<4x256x16xf32> to vector<1x256x16xf32>
    %14 = vector.shape_cast %13 : vector<1x256x16xf32> to vector<256x16xf32>
    %cst_9 = arith.constant dense<0.000000e+00> : vector<12x16xf32>
    %15 = tpu.matmul %9, %14, %cst_9 {dimension_numbers = #tpu.dot_dimension_numbers<[1], [0], [0], [1], [0, 0, 1, 1], [], []>} : vector<12x256xf32>, vector<256x16xf32>, vector<12x16xf32> -> vector<12x16xf32>
    %16 = vector.extract_strided_slice %8 {offsets = [2, 0, 0], sizes = [1, 256, 16], strides = [1, 1, 1]} : vector<4x256x16xf32> to vector<1x256x16xf32>
    %17 = vector.shape_cast %16 : vector<1x256x16xf32> to vector<256x16xf32>
    %cst_10 = arith.constant dense<0.000000e+00> : vector<12x16xf32>
    %18 = tpu.matmul %9, %17, %cst_10 {dimension_numbers = #tpu.dot_dimension_numbers<[1], [0], [0], [1], [0, 0, 1, 1], [], []>} : vector<12x256xf32>, vector<256x16xf32>, vector<12x16xf32> -> vector<12x16xf32>
    %19 = vector.extract_strided_slice %8 {offsets = [3, 0, 0], sizes = [1, 256, 16], strides = [1, 1, 1]} : vector<4x256x16xf32> to vector<1x256x16xf32>
    %20 = vector.shape_cast %19 : vector<1x256x16xf32> to vector<256x16xf32>
    %cst_11 = arith.constant dense<0.000000e+00> : vector<12x16xf32>
    %21 = tpu.matmul %9, %20, %cst_11 {dimension_numbers = #tpu.dot_dimension_numbers<[1], [0], [0], [1], [0, 0, 1, 1], [], []>} : vector<12x256xf32>, vector<256x16xf32>, vector<12x16xf32> -> vector<12x16xf32>
    %22 = vector.shape_cast %12 : vector<12x16xf32> to vector<1x12x16xf32>
    %23 = vector.shape_cast %15 : vector<12x16xf32> to vector<1x12x16xf32>
    %24 = vector.shape_cast %18 : vector<12x16xf32> to vector<1x12x16xf32>
    %25 = vector.shape_cast %21 : vector<12x16xf32> to vector<1x12x16xf32>
    %26 = tpu.concatenate %22, %23, %24, %25 in 0 : vector<1x12x16xf32>, vector<1x12x16xf32>, vector<1x12x16xf32>, vector<1x12x16xf32> -> vector<4x12x16xf32>
    %cst_12 = arith.constant dense<0xFF800000> : vector<4x12xf32>
    %27 = vector.multi_reduction <maximumf>, %26, %cst_12 [2] : vector<4x12x16xf32> to vector<4x12xf32>
    %28 = vector.shape_cast %27 : vector<4x12xf32> to vector<4x12x1xf32>
    %29 = vector.broadcast %28 : vector<4x12x1xf32> to vector<4x12x16xf32>
    %30 = arith.subf %26, %29 : vector<4x12x16xf32>
    %31 = math.exp %30 : vector<4x12x16xf32>
    %cst_13 = arith.constant dense<0.000000e+00> : vector<4x12xf32>
    %32 = vector.multi_reduction <add>, %31, %cst_13 [2] : vector<4x12x16xf32> to vector<4x12xf32>
    %33 = vector.shape_cast %32 : vector<4x12xf32> to vector<4x12x1xf32>
    %34 = vector.broadcast %33 : vector<4x12x1xf32> to vector<4x12x16xf32>
    %35 = arith.divf %31, %34 : vector<4x12x16xf32>
    %c0_14 = arith.constant 0 : index
    %c0_15 = arith.constant 0 : index
    %c0_16 = arith.constant 0 : index
    %36 = vector.load %arg6[%c0_14, %c0_15, %c0_16] : memref<4x12x16xf32, #tpu.memory_space<vmem>>, vector<4x12x16xf32>
    tpu.vector_store %arg6[%c0_14, %c0_15, %c0_16], %35 {strides = array<i32>} : memref<4x12x16xf32, #tpu.memory_space<vmem>>, vector<4x12x16xf32>,
    return
  }
  func.func @transform_0(%arg0: i32) -> (i32, i32, i32) {
    %c0_i32 = arith.constant 0 : i32
    %c0_i32_0 = arith.constant 0 : i32
    %c0_i32_1 = arith.constant 0 : i32
    return %arg0, %c0_i32, %c0_i32_0 : i32, i32, i32
  }
  func.func @transform_1(%arg0: i32) -> (i32, i32) {
    %c0_i32 = arith.constant 0 : i32
    %c0_i32_0 = arith.constant 0 : i32
    %c0_i32_1 = arith.constant 0 : i32
    return %c0_i32, %c0_i32_0 : i32, i32
  }
  func.func @transform_2(%arg0: i32) -> (i32, i32) {
    %c0_i32 = arith.constant 0 : i32
    %c0_i32_0 = arith.constant 0 : i32
    %c0_i32_1 = arith.constant 0 : i32
    return %c0_i32, %c0_i32_0 : i32, i32
  }
  func.func @transform_3(%arg0: i32) -> (i32, i32) {
    %c0_i32 = arith.constant 0 : i32
    %c0_i32_0 = arith.constant 0 : i32
    %c0_i32_1 = arith.constant 0 : i32
    return %c0_i32, %c0_i32_0 : i32, i32
  }
  func.func @transform_4(%arg0: i32) -> i32 {
    %c0_i32 = arith.constant 0 : i32
    %c0_i32_0 = arith.constant 0 : i32
    return %c0_i32 : i32
  }
  func.func @transform_5(%arg0: i32) -> (i32, i32, i32) {
    %c0_i32 = arith.constant 0 : i32
    %c0_i32_0 = arith.constant 0 : i32
    %c0_i32_1 = arith.constant 0 : i32
    return %arg0, %c0_i32, %c0_i32_0 : i32, i32, i32
  }
}

</mosaic_0001>

<bundles_post_ra>
// kernel: tpu_custom_call.1
= control target key start
LH: loop header
LB: loop body
LE: loop exit
PB: predicated region body
PF: predicated region fallthrough
CT: control target
= control target key end

     0   :  { %vm153_vm0 = vcmask 261120   ;;  %vm1287_vm1 = vcmask 130048   ;;  %vm1291_vm2 = vcmask 125952   ;;  %s2914_s1 = inlined_call_operand.vmem [shape: f32[32,16], index: 1, kind: input, shape index: {}]   ;;  %s2915_s4 = inlined_call_operand.<no memory space> [shape: f32[1], index: 4, kind: input, shape index: {}]   ;;  %s2916_s0 = inlined_call_operand.vmem [shape: f32[4,256,32], index: 0, kind: input, shape index: {}]   ;;  %s2917_s3 = inlined_call_operand.vmem [shape: f32[256,16], index: 3, kind: input, shape index: {}]   ;;  %s2918_s2 = inlined_call_operand.vmem [shape: f32[12,256], index: 2, kind: input, shape index: {}]   ;;  %s2919_s5 = inlined_call_operand.vmem [shape: f32[4,12,16], index: 5, kind: output, shape index: {}]  }
   0x1   :  { %v152_v0 = vld [vmem:[%s2914_s1 + $0x18] sm:$0xff]  ;;  %v151_v1 = vld [vmem:[%s2914_s1 + $0x10] sm:$0xff]  ;;  %v150_v2 = vld [vmem:[%s2914_s1 + $0x8] sm:$0xff] }
   0x2   :  { %550 = vmatpush.msra.mxu0 %v152_v0  ;;  %1621 = vmatpush.msra.mxu1 %v152_v0  ;;  %v149_v3 = vld [vmem:[%s2914_s1] sm:$0xff]  ;;  %v22_v6 = vld [vmem:[%s2916_s0 + $0x8] sm:$0xff]  ;;  %v115_v8 = vld [vmem:[%s2916_s0 + $0x2f0] sm:$0xff] }
   0x3   :  { %1623 = vmatpush.msra.mxu3 %v152_v0  ;;  %1622 = vmatpush.msra.mxu2 %v152_v0  ;;  %v21_v4 = vld [vmem:[%s2916_s0] sm:$0xff]  ;;  %v62_v7 = vld [vmem:[%s2916_s0 + $0x148] sm:$0xff]  ;;  %v23_v9 = vld [vmem:[%s2916_s0 + $0x10] sm:$0xff] }
   0x4   :  { %551 = vmatpush.msra.mxu0 %v151_v1  ;;  %1624 = vmatpush.msra.mxu1 %v151_v1  ;;  %v61_v5 = vld [vmem:[%s2916_s0 + $0x140] sm:$0xff]  ;;  %v63_v10 = vld [vmem:[%s2916_s0 + $0x150] sm:$0xff]  ;;  %v116_v11 = vld [vmem:[%s2916_s0 + $0x2f8] sm:$0xff] }
   0x5   :  { %1626 = vmatpush.msra.mxu3 %v151_v1  ;;  %1625 = vmatpush.msra.mxu2 %v151_v1  ;;  %v24_v12 = vld [vmem:[%s2916_s0 + $0x18] sm:$0xff]  ;;  %v117_v14 = vld [vmem:[%s2916_s0 + $0x300] sm:$0xff]  ;;  %v118_v17 = vld [vmem:[%s2916_s0 + $0x308] sm:$0xff] }
   0x6   :  { %552 = vmatpush.msra.mxu0 %v150_v2  ;;  %1627 = vmatpush.msra.mxu1 %v150_v2  ;;  %v64_v13 = vld [vmem:[%s2916_s0 + $0x158] sm:$0xff]  ;;  %v25_v15 = vld [vmem:[%s2916_s0 + $0x20] sm:$0xff]  ;;  %v26_v18 = vld [vmem:[%s2916_s0 + $0x28] sm:$0xff] }
   0x7   :  { %1629 = vmatpush.msra.mxu3 %v150_v2  ;;  %1628 = vmatpush.msra.mxu2 %v150_v2  ;;  %v65_v16 = vld [vmem:[%s2916_s0 + $0x160] sm:$0xff]  ;;  %v66_v19 = vld [vmem:[%s2916_s0 + $0x168] sm:$0xff]  ;;  %v119_v20 = vld [vmem:[%s2916_s0 + $0x310] sm:$0xff] }
   0x8   :  { %553 = vmatpush.msra.mxu0 %v149_v3  ;;  %1630 = vmatpush.msra.mxu1 %v149_v3  ;;  %v27_v21 = vld [vmem:[%s2916_s0 + $0x30] sm:$0xff]  ;;  %v120_v23 = vld [vmem:[%s2916_s0 + $0x318] sm:$0xff]  ;;  %v121_v26 = vld [vmem:[%s2916_s0 + $0x320] sm:$0xff] }
   0x9   :  { %1493 = vmatmul.msk.f32.vlgmr.msra.gmra.mxu0 %vm153_vm0, %v21_v4  ;;  %1533 = vmatmul.msk.f32.vlgmr.msra.gmra.mxu1 %vm153_vm0, %v61_v5  ;;  %v67_v22 = vld [vmem:[%s2916_s0 + $0x170] sm:$0xff]  ;;  %v28_v24 = vld [vmem:[%s2916_s0 + $0x38] sm:$0xff]  ;;  %v29_v27 = vld [vmem:[%s2916_s0 + $0x40] sm:$0xff] }
   0xa   :  { %1632 = vmatpush.msra.mxu3 %v149_v3  ;;  %1631 = vmatpush.msra.mxu2 %v149_v3  ;;  %v68_v25 = vld [vmem:[%s2916_s0 + $0x178] sm:$0xff]  ;;  %v69_v28 = vld [vmem:[%s2916_s0 + $0x180] sm:$0xff]  ;;  %v122_v29 = vld [vmem:[%s2916_s0 + $0x328] sm:$0xff] }
   0xb   :  { %1587 = vmatmul.msk.f32.vlgmr.msra.gmra.mxu3 %vm153_vm0, %v115_v8  ;;  %v30_v30 = vld [vmem:[%s2916_s0 + $0x48] sm:$0xff]  ;;  %v123_v32 = vld [vmem:[%s2916_s0 + $0x330] sm:$0xff]  ;;  %v124_v35 = vld [vmem:[%s2916_s0 + $0x338] sm:$0xff] }
   0xc   :  { %v70_v31 = vld [vmem:[%s2916_s0 + $0x188] sm:$0xff]  ;;  %v31_v33 = vld [vmem:[%s2916_s0 + $0x50] sm:$0xff]  ;;  %v32_v36 = vld [vmem:[%s2916_s0 + $0x58] sm:$0xff] }
   0xd   :  { %v71_v34 = vld [vmem:[%s2916_s0 + $0x190] sm:$0xff]  ;;  %v72_v37 = vld [vmem:[%s2916_s0 + $0x198] sm:$0xff]  ;;  %v125_v38 = vld [vmem:[%s2916_s0 + $0x340] sm:$0xff] }
   0xe   :  { %v33_v39 = vld [vmem:[%s2916_s0 + $0x60] sm:$0xff]  ;;  %v126_v41 = vld [vmem:[%s2916_s0 + $0x348] sm:$0xff]  ;;  %v127_v45 = vld [vmem:[%s2916_s0 + $0x350] sm:$0xff] }
   0xf   :  { %v73_v40 = vld [vmem:[%s2916_s0 + $0x1a0] sm:$0xff]  ;;  %v90_v42 = vld [vmem:[%s2916_s0 + $0x228] sm:$0xff]  ;;  %v91_v46 = vld [vmem:[%s2916_s0 + $0x230] sm:$0xff] }
  0x10   :  { %v34_v43 = vld [vmem:[%s2916_s0 + $0x68] sm:$0xff]  ;;  %1562 = vmatmul.msk.f32.vlgmr.msra.gmra.mxu2 %vm153_vm0, %v90_v42  ;;  %v35_v47 = vld [vmem:[%s2916_s0 + $0x70] sm:$0xff]  ;;  %v128_v49 = vld [vmem:[%s2916_s0 + $0x358] sm:$0xff] }
  0x11   :  { %1494 = vmatmul.msk.f32.gmra.mxu0 %vm153_vm0, %v22_v6  ;;  %1534 = vmatmul.msk.f32.gmra.mxu1 %vm153_vm0, %v62_v7  ;;  %v74_v44 = vld [vmem:[%s2916_s0 + $0x1a8] sm:$0xff]  ;;  %v75_v48 = vld [vmem:[%s2916_s0 + $0x1b0] sm:$0xff]  ;;  %v92_v50 = vld [vmem:[%s2916_s0 + $0x238] sm:$0xff] }
  0x12   :  { %v36_v51 = vld [vmem:[%s2916_s0 + $0x78] sm:$0xff]  ;;  %v129_v53 = vld [vmem:[%s2916_s0 + $0x360] sm:$0xff]  ;;  %v130_v59 = vld [vmem:[%s2916_s0 + $0x368] sm:$0xff] }
  0x13   :  { %1588 = vmatmul.msk.f32.gmra.mxu3 %vm153_vm0, %v116_v11  ;;  %v76_v52 = vld [vmem:[%s2916_s0 + $0x1b8] sm:$0xff]  ;;  %v93_v54 = vld [vmem:[%s2916_s0 + $0x240] sm:$0xff]  ;;  %v94_v60 = vld [vmem:[%s2916_s0 + $0x248] sm:$0xff] }
  0x14   :  { %v37_v57 = vld [vmem:[%s2916_s0 + $0x80] sm:$0xff]  ;;  %v38_v63 = vld [vmem:[%s2916_s0 + $0x88] sm:$0xff]  ;;  %v131_v1 = vld [vmem:[%s2916_s0 + $0x370] sm:$0xff] }
  0x15   :  { %v77_v58 = vld [vmem:[%s2916_s0 + $0x1c0] sm:$0xff]  ;;  %v78_v0 = vld [vmem:[%s2916_s0 + $0x1c8] sm:$0xff]  ;;  %v95_v3 = vld [vmem:[%s2916_s0 + $0x250] sm:$0xff] }
  0x16   :  { %v39_v6 = vld [vmem:[%s2916_s0 + $0x90] sm:$0xff]  ;;  %v132_v8 = vld [vmem:[%s2916_s0 + $0x378] sm:$0xff] }
  0x17   :  { %v79_v7 = vld [vmem:[%s2916_s0 + $0x1d0] sm:$0xff]  ;;  %v44_v42 = vld [vmem:[%s2916_s0 + $0xb8] sm:$0xff] }
  0x18   :  { %1563 = vmatmul.msk.f32.gmra.mxu2 %vm153_vm0, %v91_v46  ;;  %v137_v46 = vld [vmem:[%s2916_s0 + $0x3a0] sm:$0xff] }
  0x19   :  { %1495 = vmatmul.msk.f32.gmra.mxu0 %vm153_vm0, %v23_v9  ;;  %1535 = vmatmul.msk.f32.gmra.mxu1 %vm153_vm0, %v63_v10  ;;  %v96_v10 = vld [vmem:[%s2916_s0 + $0x258] sm:$0xff] }
  0x1b   :  { %1589 = vmatmul.msk.f32.gmra.mxu3 %vm153_vm0, %v117_v14  ;;  %v80_v14 = vld [vmem:[%s2916_s0 + $0x1d8] sm:$0xff] }
  0x20   :  { %1564 = vmatmul.msk.f32.gmra.mxu2 %vm153_vm0, %v92_v50 }
  0x21   :  { %1496 = vmatmul.msk.f32.gmra.mxu0 %vm153_vm0, %v24_v12  ;;  %1536 = vmatmul.msk.f32.gmra.mxu1 %vm153_vm0, %v64_v13  ;;  %v40_v13 = vld [vmem:[%s2916_s0 + $0x98] sm:$0xff] }
  0x23   :  { %1590 = vmatmul.msk.f32.gmra.mxu3 %vm153_vm0, %v118_v17  ;;  %v97_v17 = vld [vmem:[%s2916_s0 + $0x260] sm:$0xff] }
  0x28   :  { %1565 = vmatmul.msk.f32.gmra.mxu2 %vm153_vm0, %v93_v54 }
  0x29   :  { %1497 = vmatmul.msk.f32.gmra.mxu0 %vm153_vm0, %v25_v15  ;;  %1537 = vmatmul.msk.f32.gmra.mxu1 %vm153_vm0, %v65_v16  ;;  %v133_v15 = vld [vmem:[%s2916_s0 + $0x380] sm:$0xff] }
  0x2b   :  { %1591 = vmatmul.msk.f32.gmra.mxu3 %vm153_vm0, %v119_v20  ;;  %v41_v20 = vld [vmem:[%s2916_s0 + $0xa0] sm:$0xff] }
  0x30   :  { %1566 = vmatmul.msk.f32.gmra.mxu2 %vm153_vm0, %v94_v60 }
  0x31   :  { %1498 = vmatmul.msk.f32.gmra.mxu0 %vm153_vm0, %v26_v18  ;;  %1538 = vmatmul.msk.f32.gmra.mxu1 %vm153_vm0, %v66_v19 }
  0x33   :  { %1592 = vmatmul.msk.f32.gmra.mxu3 %vm153_vm0, %v120_v23 }
  0x38   :  { %1567 = vmatmul.msk.f32.gmra.mxu2 %vm153_vm0, %v95_v3  ;;  %v2130_v3 = vld [vmem:[%s2917_s3 + $0x48] sm:$0xff] }
  0x39   :  { %1499 = vmatmul.msk.f32.gmra.mxu0 %vm153_vm0, %v27_v21  ;;  %1539 = vmatmul.msk.f32.gmra.mxu1 %vm153_vm0, %v67_v22  ;;  %v81_v21 = vld [vmem:[%s2916_s0 + $0x1e0] sm:$0xff]  ;;  %v134_v22 = vld [vmem:[%s2916_s0 + $0x388] sm:$0xff] }
  0x3b   :  { %1593 = vmatmul.msk.f32.gmra.mxu3 %vm153_vm0, %v121_v26 }
  0x40   :  { %1568 = vmatmul.msk.f32.gmra.mxu2 %vm153_vm0, %v96_v10 }
  0x41   :  { %1500 = vmatmul.msk.f32.gmra.mxu0 %vm153_vm0, %v28_v24  ;;  %1540 = vmatmul.msk.f32.gmra.mxu1 %vm153_vm0, %v68_v25  ;;  %v98_v24 = vld [vmem:[%s2916_s0 + $0x268] sm:$0xff] }
  0x43   :  { %1594 = vmatmul.msk.f32.gmra.mxu3 %vm153_vm0, %v122_v29  ;;  %v135_v29 = vld [vmem:[%s2916_s0 + $0x390] sm:$0xff] }
  0x48   :  { %1569 = vmatmul.msk.f32.gmra.mxu2 %vm153_vm0, %v97_v17 }
  0x49   :  { %1501 = vmatmul.msk.f32.gmra.mxu0 %vm153_vm0, %v29_v27  ;;  %1541 = vmatmul.msk.f32.gmra.mxu1 %vm153_vm0, %v69_v28  ;;  %v42_v27 = vld [vmem:[%s2916_s0 + $0xa8] sm:$0xff] }
  0x4a   :  { %v82_v28 = vld [vmem:[%s2916_s0 + $0x1e8] sm:$0xff] }
  0x4b   :  { %1595 = vmatmul.msk.f32.gmra.mxu3 %vm153_vm0, %v123_v32 }
  0x50   :  { %1570 = vmatmul.msk.f32.gmra.mxu2 %vm153_vm0, %v98_v24  ;;  %v104_v24 = vld [vmem:[%s2916_s0 + $0x298] sm:$0xff] }
  0x51   :  { %1502 = vmatmul.msk.f32.gmra.mxu0 %vm153_vm0, %v30_v30  ;;  %1542 = vmatmul.msk.f32.gmra.mxu1 %vm153_vm0, %v70_v31  ;;  %v99_v31 = vld [vmem:[%s2916_s0 + $0x270] sm:$0xff] }
  0x53   :  { %1596 = vmatmul.msk.f32.gmra.mxu3 %vm153_vm0, %v124_v35  ;;  %v83_v35 = vld [vmem:[%s2916_s0 + $0x1f0] sm:$0xff] }
  0x58   :  { %1571 = vmatmul.msk.f32.gmra.mxu2 %vm153_vm0, %v99_v31 }
  0x59   :  { %1503 = vmatmul.msk.f32.gmra.mxu0 %vm153_vm0, %v31_v33  ;;  %1543 = vmatmul.msk.f32.gmra.mxu1 %vm153_vm0, %v71_v34  ;;  %v43_v34 = vld [vmem:[%s2916_s0 + $0xb0] sm:$0xff] }
  0x5b   :  { %1597 = vmatmul.msk.f32.gmra.mxu3 %vm153_vm0, %v125_v38 }
  0x61   :  { %1504 = vmatmul.msk.f32.gmra.mxu0 %vm153_vm0, %v32_v36  ;;  %1544 = vmatmul.msk.f32.gmra.mxu1 %vm153_vm0, %v72_v37  ;;  %v136_v36 = vld [vmem:[%s2916_s0 + $0x398] sm:$0xff] }
  0x62   :  { %v2054_v37 = vld [vmem:[%s2917_s3 + $0x78] sm:$0xff] }
  0x63   :  { %1598 = vmatmul.msk.f32.gmra.mxu3 %vm153_vm0, %v126_v41 }
  0x69   :  { %1505 = vmatmul.msk.f32.gmra.mxu0 %vm153_vm0, %v33_v39  ;;  %1545 = vmatmul.msk.f32.gmra.mxu1 %vm153_vm0, %v73_v40  ;;  %v100_v39 = vld [vmem:[%s2916_s0 + $0x278] sm:$0xff] }
  0x6a   :  { %1572 = vmatmul.msk.f32.gmra.mxu2 %vm153_vm0, %v100_v39  ;;  %v142_v39 = vld [vmem:[%s2916_s0 + $0x3c8] sm:$0xff] }
  0x6b   :  { %1599 = vmatmul.msk.f32.gmra.mxu3 %vm153_vm0, %v127_v45 }
  0x71   :  { %1506 = vmatmul.msk.f32.gmra.mxu0 %vm153_vm0, %v34_v43  ;;  %1546 = vmatmul.msk.f32.gmra.mxu1 %vm153_vm0, %v74_v44  ;;  %v84_v43 = vld [vmem:[%s2916_s0 + $0x1f8] sm:$0xff]  ;;  %v2073_v44 = vld [vmem:[%s2917_s3 + $0x70] sm:$0xff] }
  0x73   :  { %1600 = vmatmul.msk.f32.gmra.mxu3 %vm153_vm0, %v128_v49  ;;  %v2091_v49 = vld [vmem:[%s2917_s3 + $0x60] sm:$0xff] }
  0x79   :  { %1507 = vmatmul.msk.f32.gmra.mxu0 %vm153_vm0, %v35_v47  ;;  %1547 = vmatmul.msk.f32.gmra.mxu1 %vm153_vm0, %v75_v48  ;;  %v2082_v47 = vld [vmem:[%s2917_s3 + $0x68] sm:$0xff] }
  0x7b   :  { %1601 = vmatmul.msk.f32.gmra.mxu3 %vm153_vm0, %v129_v53  ;;  %v101_v53 = vld [vmem:[%s2916_s0 + $0x280] sm:$0xff] }
  0x7c   :  { %1573 = vmatmul.msk.f32.gmra.mxu2 %vm153_vm0, %v101_v53 }
  0x81   :  { %1508 = vmatmul.msk.f32.gmra.mxu0 %vm153_vm0, %v36_v51  ;;  %1548 = vmatmul.msk.f32.gmra.mxu1 %vm153_vm0, %v76_v52  ;;  %v2097_v51 = vld [vmem:[%s2917_s3 + $0x58] sm:$0xff] }
  0x83   :  { %1602 = vmatmul.msk.f32.gmra.mxu3 %vm153_vm0, %v130_v59  ;;  %v45_v59 = vld [vmem:[%s2916_s0 + $0xc0] sm:$0xff] }
  0x86   :  { %v1910_v55 = vpop.f32.mrf.mxu0  ;;  %v1912_v56 = vpop.f32.mrf.mxu1 }
  0x89   :  { %1509 = vmatmul.msk.f32.gmra.mxu0 %vm153_vm0, %v37_v57  ;;  %1549 = vmatmul.msk.f32.gmra.mxu1 %vm153_vm0, %v77_v58 }
  0x8b   :  { %1603 = vmatmul.msk.f32.gmra.mxu3 %vm153_vm0, %v131_v1 }
  0x8e   :  { %v1930_v61 = vpop.f32.mrf.mxu0  ;;  %v1932_v62 = vpop.f32.mrf.mxu1 }
  0x8f   :  { %v1947_v2 = vpop.f32.mrf.mxu3 }
  0x90   :  { %2924 = vst [vmem:[#allocation3_spill] sm:$0xff] %v1947_v2  ;;  %v57_v2 = vld [vmem:[%s2916_s0 + $0x120] sm:$0xff] }
  0x91   :  { %1510 = vmatmul.msk.f32.gmra.mxu0 %vm153_vm0, %v38_v63  ;;  %1550 = vmatmul.msk.f32.gmra.mxu1 %vm153_vm0, %v78_v0  ;;  %v138_v63 = vld [vmem:[%s2916_s0 + $0x3a8] sm:$0xff]  ;;  %v2121_v0 = vld [vmem:[%s2917_s3 + $0x50] sm:$0xff] }
  0x93   :  { %1604 = vmatmul.msk.f32.gmra.mxu3 %vm153_vm0, %v132_v8 }
  0x96   :  { %v1952_v4 = vpop.f32.mrf.mxu0  ;;  %v1954_v5 = vpop.f32.mrf.mxu1 }
  0x97   :  { %v1969_v9 = vpop.f32.mrf.mxu3  ;;  %v1013_v1 = vmul.f32 %v2121_v0, %v1954_v5  ;;  %v102_v5 = vld [vmem:[%s2916_s0 + $0x288] sm:$0xff] }
  0x98   :  { %2925 = vst [vmem:[#allocation4_spill] sm:$0xff] %v1969_v9  ;;  %1574 = vmatmul.msk.f32.gmra.mxu2 %vm153_vm0, %v102_v5 }
  0x99   :  { %1511 = vmatmul.msk.f32.gmra.mxu0 %vm153_vm0, %v39_v6  ;;  %1551 = vmatmul.msk.f32.gmra.mxu1 %vm153_vm0, %v79_v7  ;;  %v1012_v6 = vmul.f32 %v2130_v3, %v1932_v62  ;;  %v2137_v7 = vld [vmem:[%s2917_s3 + $0x40] sm:$0xff]  ;;  %v46_v62 = vld [vmem:[%s2916_s0 + $0xc8] sm:$0xff] }
  0x9a   :  { %v1011_v10 = vmul.f32 %v2137_v7, %v1912_v56 }
  0x9b   :  { %1605 = vmatmul.msk.f32.gmra.mxu3 %vm153_vm0, %v133_v15  ;;  %v103_v15 = vld [vmem:[%s2916_s0 + $0x290] sm:$0xff] }
  0x9e   :  { %v1974_v11 = vpop.f32.mrf.mxu0  ;;  %v1976_v12 = vpop.f32.mrf.mxu1 }
  0x9f   :  { %v1991_v16 = vpop.f32.mrf.mxu3  ;;  %v1014_v60 = vmul.f32 %v2097_v51, %v1976_v12 }
  0xa0   :  { %1575 = vmatmul.msk.f32.gmra.mxu2 %vm153_vm0, %v103_v15 }
  0xa1   :  { %1512 = vmatmul.msk.f32.gmra.mxu0 %vm153_vm0, %v40_v13  ;;  %1552 = vmatmul.msk.f32.gmra.mxu1 %vm153_vm0, %v80_v14  ;;  %v139_v14 = vld [vmem:[%s2916_s0 + $0x3b0] sm:$0xff] }
  0xa3   :  { %1606 = vmatmul.msk.f32.gmra.mxu3 %vm153_vm0, %v134_v22 }
  0xa6   :  { %v1996_v18 = vpop.f32.mrf.mxu0  ;;  %v687_v19 = vpop.f32.mrf.mxu1 }
  0xa7   :  { %v2011_v23 = vpop.f32.mrf.mxu3  ;;  %v1015_v54 = vmul.f32 %v2091_v49, %v687_v19 }
  0xa8   :  { %1576 = vmatmul.msk.f32.gmra.mxu2 %vm153_vm0, %v104_v24 }
  0xa9   :  { %1513 = vmatmul.msk.f32.gmra.mxu0 %vm153_vm0, %v41_v20  ;;  %1553 = vmatmul.msk.f32.gmra.mxu1 %vm153_vm0, %v81_v21  ;;  %v47_v20 = vld [vmem:[%s2916_s0 + $0xd0] sm:$0xff]  ;;  %v140_v21 = vld [vmem:[%s2916_s0 + $0x3b8] sm:$0xff] }
  0xab   :  { %1607 = vmatmul.msk.f32.gmra.mxu3 %vm153_vm0, %v135_v29  ;;  %v141_v29 = vld [vmem:[%s2916_s0 + $0x3c0] sm:$0xff] }
  0xae   :  { %v2016_v25 = vpop.f32.mrf.mxu0  ;;  %v690_v26 = vpop.f32.mrf.mxu1 }
  0xaf   :  { %v2031_v30 = vpop.f32.mrf.mxu3  ;;  %v1016_v50 = vmul.f32 %v2082_v47, %v690_v26 }
  0xb1   :  { %1514 = vmatmul.msk.f32.gmra.mxu0 %vm153_vm0, %v42_v27  ;;  %1554 = vmatmul.msk.f32.gmra.mxu1 %vm153_vm0, %v82_v28  ;;  %v48_v28 = vld [vmem:[%s2916_s0 + $0xd8] sm:$0xff] }
  0xb3   :  { %1608 = vmatmul.msk.f32.gmra.mxu3 %vm153_vm0, %v136_v36  ;;  %v49_v36 = vld [vmem:[%s2916_s0 + $0xe0] sm:$0xff] }
  0xb6   :  { %v2036_v32 = vpop.f32.mrf.mxu0  ;;  %v693_v33 = vpop.f32.mrf.mxu1 }
  0xb7   :  { %v2056_v38 = vpop.f32.mrf.mxu3  ;;  %v1017_v48 = vmul.f32 %v2073_v44, %v693_v33  ;;  %v105_v33 = vld [vmem:[%s2916_s0 + $0x2a0] sm:$0xff] }
  0xb8   :  { %1577 = vmatmul.msk.f32.gmra.mxu2 %vm153_vm0, %v105_v33 }
  0xb9   :  { %1515 = vmatmul.msk.f32.gmra.mxu0 %vm153_vm0, %v43_v34  ;;  %1555 = vmatmul.msk.f32.gmra.mxu1 %vm153_vm0, %v83_v35 }
  0xbb   :  { %1609 = vmatmul.msk.f32.gmra.mxu3 %vm153_vm0, %v137_v46  ;;  %v50_v46 = vld [vmem:[%s2916_s0 + $0xe8] sm:$0xff] }
  0xbe   :  { %v2061_v40 = vpop.f32.mrf.mxu0  ;;  %v696_v41 = vpop.f32.mrf.mxu1 }
  0xbf   :  { %v1018_v45 = vmul.f32 %v2054_v37, %v696_v41  ;;  %v2099_v52 = vpop.f32.mrf.mxu3 }
  0xc1   :  { %1516 = vmatmul.msk.f32.gmra.mxu0 %vm153_vm0, %v44_v42  ;;  %1556 = vmatmul.msk.f32.gmra.mxu1 %vm153_vm0, %v84_v43  ;;  %v106_v42 = vld [vmem:[%s2916_s0 + $0x2a8] sm:$0xff] }
  0xc2   :  { %1149 = vmatpush.msrb.mxu3 %v1018_v45  ;;  %1578 = vmatmul.msk.f32.gmra.mxu2 %vm153_vm0, %v106_v42 }
  0xc3   :  { %1610 = vmatmul.msk.f32.gmra.mxu3 %vm153_vm0, %v138_v63 }
  0xc4   :  { %1150 = vmatpush.msrb.mxu3 %v1017_v48  ;;  %v143_v48 = vld [vmem:[%s2916_s0 + $0x3d0] sm:$0xff] }
  0xc6   :  { %v2105_v57 = vpop.f32.mrf.mxu0  ;;  %v2107_v58 = vpop.f32.mrf.mxu1  ;;  %1151 = vmatpush.msrb.mxu3 %v1016_v50 }
  0xc7   :  { %v2139_v8 = vpop.f32.mrf.mxu3  ;;  %v2226_v50 = vpop.f32.mrf.mxu2 }
  0xc8   :  { %1152 = vmatpush.msrb.mxu3 %v1015_v54  ;;  %2926 = vst [vmem:[#allocation5_spill] sm:$0xff] %v2226_v50  ;;  %v85_v54 = vld [vmem:[%s2916_s0 + $0x200] sm:$0xff]  ;;  %v58_v50 = vld [vmem:[%s2916_s0 + $0x128] sm:$0xff] }
  0xc9   :  { %1517 = vmatmul.msk.f32.gmra.mxu0 %vm153_vm0, %v45_v59  ;;  %v107_v59 = vld [vmem:[%s2916_s0 + $0x2b0] sm:$0xff]  ;;  %1557 = vmatmul.msk.f32.gmra.mxu1 %vm153_vm0, %v85_v54 }
  0xca   :  { %1153 = vmatpush.msrb.mxu3 %v1014_v60  ;;  %1579 = vmatmul.msk.f32.gmra.mxu2 %vm153_vm0, %v107_v59 }
  0xcb   :  { %1611 = vmatmul.msk.f32.gmra.mxu3 %vm153_vm0, %v139_v14  ;;  %v108_v14 = vld [vmem:[%s2916_s0 + $0x2b8] sm:$0xff] }
  0xcc   :  { %1154 = vmatpush.msrb.mxu3 %v1013_v1  ;;  %v51_v1 = vld [vmem:[%s2916_s0 + $0xf0] sm:$0xff] }
  0xce   :  { %v2146_v12 = vpop.f32.mrf.mxu0  ;;  %v2148_v13 = vpop.f32.mrf.mxu1  ;;  %1155 = vmatpush.msrb.mxu3 %v1012_v6  ;;  %v144_v6 = vld [vmem:[%s2916_s0 + $0x3d8] sm:$0xff] }
  0xcf   :  { %v2159_v56 = vpop.f32.mrf.mxu3  ;;  %v2248_v5 = vpop.f32.mrf.mxu2 }
  0xd0   :  { %1156 = vmatpush.msrb.mxu3 %v1011_v10  ;;  %2927 = vst [vmem:[#allocation6_spill] sm:$0xff] %v2248_v5  ;;  %v59_v5 = vld [vmem:[%s2916_s0 + $0x130] sm:$0xff] }
  0xd1   :  { %1518 = vmatmul.msk.f32.gmra.mxu0 %vm153_vm0, %v46_v62  ;;  %v86_v62 = vld [vmem:[%s2916_s0 + $0x208] sm:$0xff] }
  0xd2   :  { %1558 = vmatmul.msk.f32.gmra.mxu1 %vm153_vm0, %v86_v62  ;;  %1580 = vmatmul.msk.f32.gmra.mxu2 %vm153_vm0, %v108_v14  ;;  %v980_v62 = vmul.f32 %v2130_v3, %v2146_v12  ;;  %v979_v14 = vmul.f32 %v2137_v7, %v2105_v57  ;;  %v2325_v12 = vld [vmem:[%s2917_s3 + $0x30] sm:$0xff]  ;;  %v54_v57 = vld [vmem:[%s2916_s0 + $0x108] sm:$0xff] }
  0xd3   :  { %1612 = vmatmul.msk.f32.gmra.mxu3 %vm153_vm0, %v140_v21  ;;  %v52_v21 = vld [vmem:[%s2916_s0 + $0xf8] sm:$0xff] }
  0xd6   :  { %v2164_v17 = vpop.f32.mrf.mxu0  ;;  %v2166_v19 = vpop.f32.mrf.mxu1 }
  0xd7   :  { %v2177_v22 = vpop.f32.mrf.mxu3  ;;  %v2272_v33 = vpop.f32.mrf.mxu2 }
  0xd8   :  { %2928 = vst [vmem:[#allocation7_spill] sm:$0xff] %v2272_v33 }
  0xd9   :  { %1519 = vmatmul.msk.f32.gmra.mxu0 %vm153_vm0, %v47_v20 }
  0xdb   :  { %1613 = vmatmul.msk.f32.gmra.mxu3 %vm153_vm0, %v141_v29 }
  0xde   :  { %v2182_v26 = vpop.f32.mrf.mxu0  ;;  %v2184_v27 = vpop.f32.mrf.mxu1 }
  0xdf   :  { %v2195_v31 = vpop.f32.mrf.mxu3 }
  0xe1   :  { %1520 = vmatmul.msk.f32.gmra.mxu0 %vm153_vm0, %v48_v28  ;;  %v145_v28 = vld [vmem:[%s2916_s0 + $0x3e0] sm:$0xff] }
  0xe3   :  { %1614 = vmatmul.msk.f32.gmra.mxu3 %vm153_vm0, %v142_v39 }
  0xe6   :  { %v591_v34 = vpop.f32.mrf.mxu0  ;;  %v2200_v35 = vpop.f32.mrf.mxu1 }
  0xe7   :  { %v2211_v41 = vpop.f32.mrf.mxu3  ;;  %v983_v39 = vmul.f32 %v2091_v49, %v591_v34  ;;  %v982_v34 = vmul.f32 %v2097_v51, %v2182_v26  ;;  %v2310_v26 = vld [vmem:[%s2917_s3 + $0x38] sm:$0xff] }
  0xe9   :  { %1521 = vmatmul.msk.f32.gmra.mxu0 %vm153_vm0, %v49_v36 }
  0xeb   :  { %1615 = vmatmul.msk.f32.gmra.mxu3 %vm153_vm0, %v143_v48  ;;  %v109_v48 = vld [vmem:[%s2916_s0 + $0x2c0] sm:$0xff] }
  0xec   :  { %1581 = vmatmul.msk.f32.gmra.mxu2 %vm153_vm0, %v109_v48 }
  0xee   :  { %v594_v43 = vpop.f32.mrf.mxu0  ;;  %v2216_v45 = vpop.f32.mrf.mxu1 }
  0xef   :  { %v2229_v53 = vpop.f32.mrf.mxu3  ;;  %v984_v36 = vmul.f32 %v2082_v47, %v594_v43  ;;  %v53_v43 = vld [vmem:[%s2916_s0 + $0x100] sm:$0xff] }
  0xf1   :  { %1522 = vmatmul.msk.f32.gmra.mxu0 %vm153_vm0, %v50_v46  ;;  %v87_v46 = vld [vmem:[%s2916_s0 + $0x210] sm:$0xff] }
  0xf2   :  { %1559 = vmatmul.msk.f32.gmra.mxu1 %vm153_vm0, %v87_v46  ;;  %v977_v46 = vmul.f32 %v2325_v12, %v2036_v32 }
  0xf3   :  { %1616 = vmatmul.msk.f32.gmra.mxu3 %vm153_vm0, %v144_v6  ;;  %v2302_v6 = vpop.f32.mrf.mxu2 }
  0xf4   :  { %2930 = vst [vmem:[#allocation9_spill] sm:$0xff] %v2302_v6 }
  0xf6   :  { %v597_v60 = vpop.f32.mrf.mxu0  ;;  %v2237_v63 = vpop.f32.mrf.mxu1 }
  0xf7   :  { %v2251_v10 = vpop.f32.mrf.mxu3  ;;  %v985_v29 = vmul.f32 %v2073_v44, %v597_v60  ;;  %v146_v60 = vld [vmem:[%s2916_s0 + $0x3e8] sm:$0xff] }
  0xf9   :  { %1523 = vmatmul.msk.f32.gmra.mxu0 %vm153_vm0, %v51_v1  ;;  %v981_v1 = vmul.f32 %v2121_v0, %v2164_v17  ;;  %v88_v17 = vld [vmem:[%s2916_s0 + $0x218] sm:$0xff] }
  0xfa   :  { %1560 = vmatmul.msk.f32.gmra.mxu1 %vm153_vm0, %v88_v17 }
  0xfb   :  { %1617 = vmatmul.msk.f32.gmra.mxu3 %vm153_vm0, %v145_v28  ;;  %v2349_v48 = vpop.f32.mrf.mxu2 }
  0xfc   :  { %2932 = vst [vmem:[#allocation11_spill] sm:$0xff] %v2349_v48  ;;  %v2478_v48 = vld [vmem:[%s2917_s3 + $0xe8] sm:$0xff] }
  0xfe   :  { %v600_v15 = vpop.f32.mrf.mxu0  ;;  %v2259_v20 = vpop.f32.mrf.mxu1 }
  0xff   :  { %v986_v24 = vmul.f32 %v2054_v37, %v600_v15  ;;  %v2277_v42 = vpop.f32.mrf.mxu3 }
 0x101   :  { %1524 = vmatmul.msk.f32.gmra.mxu0 %vm153_vm0, %v52_v21  ;;  %1103 = vmatpush.msrb.mxu1 %v986_v24  ;;  %v110_v21 = vld [vmem:[%s2916_s0 + $0x2c8] sm:$0xff] }
 0x102   :  { %1582 = vmatmul.msk.f32.gmra.mxu2 %vm153_vm0, %v110_v21 }
 0x103   :  { %1104 = vmatpush.msrb.mxu1 %v985_v29  ;;  %1618 = vmatmul.msk.f32.gmra.mxu3 %vm153_vm0, %v146_v60  ;;  %v978_v29 = vmul.f32 %v2310_v26, %v2061_v40  ;;  %v2354_v40 = vld [vmem:[%s2917_s3 + $0x20] sm:$0xff] }
 0x104   :  { %v975_v32 = vmul.f32 %v2354_v40, %v1996_v18  ;;  %v55_v18 = vld [vmem:[%s2916_s0 + $0x110] sm:$0xff] }
 0x105   :  { %1105 = vmatpush.msrb.mxu1 %v984_v36  ;;  %v2341_v36 = vld [vmem:[%s2917_s3 + $0x28] sm:$0xff] }
 0x106   :  { %v2285_v54 = vpop.f32.mrf.mxu0  ;;  %v2287_v59 = vpop.f32.mrf.mxu1 }
 0x107   :  { %2929 = vst [vmem:[#allocation8_spill] sm:$0xff] %v2285_v54  ;;  %1106 = vmatpush.msrb.mxu1 %v983_v39  ;;  %v2314_v15 = vpop.f32.mrf.mxu3  ;;  %v147_v39 = vld [vmem:[%s2916_s0 + $0x3f0] sm:$0xff] }
 0x109   :  { %1525 = vmatmul.msk.f32.gmra.mxu0 %vm153_vm0, %v53_v43  ;;  %1107 = vmatpush.msrb.mxu1 %v982_v34  ;;  %v976_v43 = vmul.f32 %v2341_v36, %v2016_v25  ;;  %v2362_v34 = vld [vmem:[%s2917_s3 + $0x18] sm:$0xff]  ;;  %v2377_v25 = vld [vmem:[%s2917_s3 + $0x10] sm:$0xff] }
 0x10a   :  { %v974_v21 = vmul.f32 %v2362_v34, %v1974_v11  ;;  %v2406_v11 = vld [vmem:[%s2917_s3] sm:$0xff] }
 0x10b   :  { %1108 = vmatpush.msrb.mxu1 %v981_v1  ;;  %1619 = vmatmul.msk.f32.gmra.mxu3 %vm153_vm0, %v147_v39  ;;  %v89_v1 = vld [vmem:[%s2916_s0 + $0x220] sm:$0xff]  ;;  %v973_v39 = vmul.f32 %v2377_v25, %v1952_v4  ;;  %v112_v4 = vld [vmem:[%s2916_s0 + $0x2d8] sm:$0xff] }
 0x10c   :  { %1561 = vmatmul.msk.f32.gmra.mxu1 %vm153_vm0, %v89_v1 }
 0x10d   :  { %1109 = vmatpush.msrb.mxu1 %v980_v62  ;;  %v111_v62 = vld [vmem:[%s2916_s0 + $0x2d0] sm:$0xff] }
 0x10e   :  { %v2327_v24 = vpop.f32.mrf.mxu0  ;;  %v2329_v28 = vpop.f32.mrf.mxu1  ;;  %1583 = vmatmul.msk.f32.gmra.mxu2 %vm153_vm0, %v111_v62 }
 0x10f   :  { %2931 = vst [vmem:[#allocation10_spill] sm:$0xff] %v2327_v24  ;;  %1110 = vmatpush.msrb.mxu1 %v979_v14  ;;  %v2366_v60 = vpop.f32.mrf.mxu3 }
 0x111   :  { %1526 = vmatmul.msk.f32.gmra.mxu0 %vm153_vm0, %v54_v57  ;;  %1111 = vmatpush.msrb.mxu1 %v978_v29  ;;  %v2393_v57 = vld [vmem:[%s2917_s3 + $0x8] sm:$0xff]  ;;  %v148_v29 = vld [vmem:[%s2916_s0 + $0x3f8] sm:$0xff] }
 0x113   :  { %1112 = vmatpush.msrb.mxu1 %v977_v46  ;;  %v2401_v46 = vpop.f32.mrf.mxu2  ;;  %1620 = vmatmul.msk.f32.gmra.mxu3 %vm153_vm0, %v148_v29  ;;  %v113_v29 = vld [vmem:[%s2916_s0 + $0x2e0] sm:$0xff] }
 0x114   :  { %2934 = vst [vmem:[#allocation13_spill] sm:$0xff] %v2401_v46  ;;  %v60_v46 = vld [vmem:[%s2916_s0 + $0x138] sm:$0xff] }
 0x115   :  { %1113 = vmatpush.msrb.mxu1 %v976_v43  ;;  %v972_v43 = vmul.f32 %v2393_v57, %v1930_v61 }
 0x116   :  { %v2379_v14 = vpop.f32.mrf.mxu0  ;;  %v2381_v17 = vpop.f32.mrf.mxu1  ;;  %1584 = vmatmul.msk.f32.gmra.mxu2 %vm153_vm0, %v112_v4 }
 0x117   :  { %2933 = vst [vmem:[#allocation12_spill] sm:$0xff] %v2379_v14  ;;  %1114 = vmatpush.msrb.mxu1 %v975_v32  ;;  %v971_v32 = vmul.f32 %v2406_v11, %v1910_v55  ;;  %v2413_v1 = vpop.f32.mrf.mxu3 }
 0x119   :  { %1527 = vmatmul.msk.f32.gmra.mxu0 %vm153_vm0, %v55_v18  ;;  %1115 = vmatpush.msrb.mxu1 %v974_v21  ;;  %v56_v21 = vld [vmem:[%s2916_s0 + $0x118] sm:$0xff] }
 0x11b   :  { %1116 = vmatpush.msrb.mxu1 %v973_v39  ;;  %v2425_v61 = vpop.f32.mrf.mxu2 }
 0x11c   :  { %2935 = vst [vmem:[#allocation14_spill] sm:$0xff] %v2425_v61 }
 0x11d   :  { %1117 = vmatpush.msrb.mxu1 %v972_v43 }
 0x11e   :  { %v2418_v62 = vpop.f32.mrf.mxu0  ;;  %v732_v18 = vpop.f32.mrf.mxu1  ;;  %1585 = vmatmul.msk.f32.gmra.mxu2 %vm153_vm0, %v113_v29 }
 0x11f   :  { %1118 = vmatpush.msrb.mxu1 %v971_v32  ;;  %v2427_v55 = vpop.f32.mrf.mxu3 }
 0x120   :  { %2936 = vst [vmem:[#allocation15_spill] sm:$0xff] %v2427_v55 }
 0x121   :  { %1528 = vmatmul.msk.f32.gmra.mxu0 %vm153_vm0, %v56_v21  ;;  %v114_v21 = vld [vmem:[%s2916_s0 + $0x2e8] sm:$0xff] }
 0x123   :  { %v2439_v32 = vpop.f32.mrf.mxu2 }
 0x124   :  { %2937 = vst [vmem:[#allocation16_spill] sm:$0xff] %v2439_v32 }
 0x126   :  { %v2432_v39 = vpop.f32.mrf.mxu0  ;;  %v735_v43 = vpop.f32.mrf.mxu1  ;;  %1586 = vmatmul.msk.f32.gmra.mxu2 %vm153_vm0, %v114_v21  ;;  %v2468_v21 = vld [vmem:[%s2917_s3 + $0xf0] sm:$0xff] }
 0x127   :  { %v2441_v4 = vpop.f32.mrf.mxu3 }
 0x128   :  { %2938 = vst [vmem:[#allocation17_spill] sm:$0xff] %v2441_v4 }
 0x129   :  { %1529 = vmatmul.msk.f32.gmra.mxu0 %vm153_vm0, %v57_v2 }
 0x12b   :  { %v2453_v2 = vpop.f32.mrf.mxu2 }
 0x12c   :  { %2939 = vst [vmem:[#allocation18_spill] sm:$0xff] %v2453_v2  ;;  %v2490_v2 = vld [vmem:[%s2918_s2] sm:$0xff] }
 0x12d   :  { %2942 = vst [vmem:[#allocation21_spill] sm:$0xff] %v2490_v2  ;;  %1119 = vmatmul.f32.vlgmr.msrb.gmra.mxu1 %v2490_v2  ;;  %v2513_v2 = vld [vmem:[%s2917_s3 + $0xd0] sm:$0xff] }
 0x12e   :  { %v2446_v55 = vpop.f32.mrf.mxu0  ;;  %v738_v9 = vpop.f32.mrf.mxu1 }
 0x12f   :  { %v2460_v33 = vpop.f32.mrf.mxu3  ;;  %v1032_v54 = vmul.f32 %v2478_v48, %v738_v9 }
 0x130   :  { %2940 = vst [vmem:[#allocation19_spill] sm:$0xff] %v2460_v33 }
 0x131   :  { %1530 = vmatmul.msk.f32.gmra.mxu0 %vm153_vm0, %v58_v50  ;;  %v2473_v50 = vld [vmem:[%s2917_s3 + $0xf8] sm:$0xff] }
 0x133   :  { %v2463_v6 = vpop.f32.mrf.mxu2 }
 0x134   :  { %2941 = vst [vmem:[#allocation20_spill] sm:$0xff] %v2463_v6  ;;  %v2495_v6 = vld [vmem:[%s2917_s3 + $0xe0] sm:$0xff] }
 0x135   :  { %v1031_v14 = vmul.f32 %v2495_v6, %v735_v43 }
 0x136   :  { %v2455_v29 = vpop.f32.mrf.mxu0  ;;  %v741_v4 = vpop.f32.mrf.mxu1 }
 0x137   :  { %v1033_v61 = vmul.f32 %v2468_v21, %v741_v4  ;;  %v2500_v4 = vpop.f32.mrf.mxu3 }
 0x138   :  { %2943 = vst [vmem:[#allocation22_spill] sm:$0xff] %v2500_v4  ;;  %v1029_v4 = vmul.f32 %v2513_v2, %v2381_v17  ;;  %v2539_v17 = vld [vmem:[%s2917_s3 + $0xb8] sm:$0xff] }
 0x139   :  { %1531 = vmatmul.msk.f32.gmra.mxu0 %vm153_vm0, %v59_v5 }
 0x13b   :  { %v2507_v24 = vpop.f32.mrf.mxu2 }
 0x13c   :  { %2944 = vst [vmem:[#allocation23_spill] sm:$0xff] %v2507_v24 }
 0x13e   :  { %v2480_v33 = vpop.f32.mrf.mxu0  ;;  %v744_v5 = vpop.f32.mrf.mxu1 }
 0x13f   :  { %v1034_v32 = vmul.f32 %v2473_v50, %v744_v5  ;;  %v2505_v5 = vld [vmem:[%s2917_s3 + $0xd8] sm:$0xff]  ;;  %v2534_v43 = vpop.f32.mrf.mxu3 }
 0x140   :  { %v1030_v9 = vmul.f32 %v2505_v5, %v732_v18  ;;  %v2530_v18 = vld [vmem:[%s2917_s3 + $0xc0] sm:$0xff]  ;;  %2945 = vst [vmem:[#allocation24_spill] sm:$0xff] %v2534_v43 }
 0x141   :  { %1532 = vmatmul.msk.f32.gmra.mxu0 %vm153_vm0, %v60_v46  ;;  %1172 = vmatpush.msra.mxu1 %v1034_v32  ;;  %v2519_v46 = vld [vmem:[%s2917_s3 + $0xc8] sm:$0xff] }
 0x143   :  { %1173 = vmatpush.msra.mxu1 %v1033_v61  ;;  %v1028_v61 = vmul.f32 %v2519_v46, %v2329_v28  ;;  %v1026_v28 = vmul.f32 %v2539_v17, %v2259_v20 }
 0x145   :  { %1174 = vmatpush.msra.mxu1 %v1032_v54  ;;  %v1027_v54 = vmul.f32 %v2530_v18, %v2287_v59 }
 0x146   :  { %v2521_v32 = vpop.f32.mrf.mxu0 }
 0x147   :  { %1175 = vmatpush.msra.mxu1 %v1031_v14  ;;  %v2541_v14 = vpop.f32.mrf.mxu2 }
 0x148   :  { %2946 = vst [vmem:[#allocation25_spill] sm:$0xff] %v2541_v14  ;;  %v2557_v14 = vld [vmem:[%s2917_s3 + $0xa8] sm:$0xff] }
 0x149   :  { %1176 = vmatpush.msra.mxu1 %v1030_v9  ;;  %v2548_v9 = vld [vmem:[%s2917_s3 + $0xb0] sm:$0xff]  ;;  %v1024_v20 = vmul.f32 %v2557_v14, %v2216_v45 }
 0x14b   :  { %1177 = vmatpush.msra.mxu1 %v1029_v4  ;;  %v1025_v4 = vmul.f32 %v2548_v9, %v2237_v63  ;;  %v2568_v63 = vpop.f32.mrf.mxu3 }
 0x14c   :  { %2947 = vst [vmem:[#allocation26_spill] sm:$0xff] %v2568_v63  ;;  %v2591_v63 = vld [vmem:[%s2917_s3 + $0x88] sm:$0xff] }
 0x14d   :  { %1178 = vmatpush.msra.mxu1 %v1028_v61  ;;  %v2564_v61 = vld [vmem:[%s2917_s3 + $0xa0] sm:$0xff]  ;;  %2949 = vst [vmem:[#allocation28_spill] sm:$0xff] %v2591_v63 }
 0x14e   :  { %v2550_v59 = vpop.f32.mrf.mxu0  ;;  %v1023_v43 = vmul.f32 %v2564_v61, %v2200_v35  ;;  %v2584_v35 = vld [vmem:[%s2917_s3 + $0x90] sm:$0xff] }
 0x14f   :  { %1179 = vmatpush.msra.mxu1 %v1027_v54  ;;  %v2573_v54 = vld [vmem:[%s2917_s3 + $0x98] sm:$0xff]  ;;  %v2577_v45 = vpop.f32.mrf.mxu2 }
 0x150   :  { %2948 = vst [vmem:[#allocation27_spill] sm:$0xff] %v2577_v45  ;;  %v1020_v45 = vmul.f32 %v2591_v63, %v2148_v13  ;;  %v1081_v13 = vmul.f32 %v2073_v44, %v2366_v60  ;;  %v1080_v63 = vmul.f32 %v2082_v47, %v2314_v15 }
 0x151   :  { %1180 = vmatpush.msra.mxu1 %v1026_v28 }
 0x153   :  { %1181 = vmatpush.msra.mxu1 %v1025_v4  ;;  %v1022_v4 = vmul.f32 %v2573_v54, %v2184_v27  ;;  %v2598_v27 = vld [vmem:[%s2917_s3 + $0x80] sm:$0xff]  ;;  %v2604_v24 = vpop.f32.mrf.mxu3 }
 0x155   :  { %1182 = vmatpush.msra.mxu1 %v1024_v20  ;;  %v1021_v20 = vmul.f32 %v2584_v35, %v2166_v19  ;;  %v1082_v19 = vmul.f32 %v2054_v37, %v2413_v1  ;;  %v1078_v1 = vmul.f32 %v2097_v51, %v2251_v10  ;;  %v1074_v10 = vmul.f32 %v2310_v26, %v2177_v22 }
 0x156   :  { %v2575_v28 = vpop.f32.mrf.mxu0  ;;  %v1070_v22 = vmul.f32 %v2362_v34, %v2056_v38 }
 0x157   :  { %1183 = vmatpush.msra.mxu1 %v1023_v43  ;;  %v1019_v43 = vmul.f32 %v2598_v27, %v2107_v58  ;;  %v1079_v58 = vmul.f32 %v2091_v49, %v2277_v42  ;;  %v1075_v42 = vmul.f32 %v2137_v7, %v2195_v31 }
 0x159   :  { %1184 = vmatpush.msra.mxu1 %v1022_v4 }
 0x15b   :  { %1185 = vmatpush.msra.mxu1 %v1021_v20  ;;  %v2608_v20 = vpop.f32.mrf.mxu2  ;;  %v2618_v60 = vpop.f32.mrf.mxu3 }
 0x15c   :  { %2950 = vst [vmem:[#allocation29_spill] sm:$0xff] %v2608_v20 }
 0x15d   :  { %1186 = vmatpush.msra.mxu1 %v1020_v45 }
 0x15e   :  { %v636_v4 = vpop.f32.mrf.mxu0 }
 0x15f   :  { %1187 = vmatpush.msra.mxu1 %v1019_v43  ;;  %v1077_v43 = vmul.f32 %v2121_v0, %v2229_v53  ;;  %v1073_v53 = vmul.f32 %v2325_v12, %v2159_v56  ;;  %v1069_v56 = vmul.f32 %v2377_v25, %v2031_v30 }
 0x161   :  { %1241 = vmatpush.msrb.mxu1 %v1082_v19  ;;  %v1076_v19 = vmul.f32 %v2130_v3, %v2211_v41 }
 0x163   :  { %1242 = vmatpush.msrb.mxu1 %v1081_v13  ;;  %v2622_v15 = vpop.f32.mrf.mxu2  ;;  %v1072_v13 = vmul.f32 %v2341_v36, %v2139_v8  ;;  %v2632_v41 = vpop.f32.mrf.mxu3  ;;  %v1068_v8 = vmul.f32 %v2393_v57, %v2011_v23 }
 0x164   :  { %2951 = vst [vmem:[#allocation30_spill] sm:$0xff] %v2622_v15 }
 0x165   :  { %1243 = vmatpush.msrb.mxu1 %v1080_v63 }
 0x166   :  { %v639_v45 = vpop.f32.mrf.mxu0 }
 0x167   :  { %1244 = vmatpush.msrb.mxu1 %v1079_v58  ;;  %v1071_v58 = vmul.f32 %v2354_v40, %v2099_v52  ;;  %v999_v23 = vmul.f32 %v2495_v6, %v639_v45  ;;  %v995_v45 = vmul.f32 %v2530_v18, %v2521_v32 }
 0x169   :  { %1245 = vmatpush.msrb.mxu1 %v1078_v1 }
 0x16b   :  { %1246 = vmatpush.msrb.mxu1 %v1077_v43  ;;  %v2636_v31 = vpop.f32.mrf.mxu2  ;;  %v1067_v43 = vmul.f32 %v2406_v11, %v1991_v16  ;;  %v2646_v52 = vpop.f32.mrf.mxu3  ;;  %v998_v16 = vmul.f32 %v2505_v5, %v636_v4 }
 0x16c   :  { %2952 = vst [vmem:[#allocation31_spill] sm:$0xff] %v2636_v31 }
 0x16d   :  { %1247 = vmatpush.msrb.mxu1 %v1076_v19 }
 0x16e   :  { %v642_v63 = vpop.f32.mrf.mxu0 }
 0x16f   :  { %1248 = vmatpush.msrb.mxu1 %v1075_v42  ;;  %v1000_v30 = vmul.f32 %v2478_v48, %v642_v63  ;;  %v996_v63 = vmul.f32 %v2519_v46, %v2550_v59  ;;  %v993_v59 = vmul.f32 %v2548_v9, %v2455_v29  ;;  %v2696_v29 = vld [vmem:[%s2918_s2 + $0x8] sm:$0xff] }
 0x171   :  { %1249 = vmatpush.msrb.mxu1 %v1074_v10 }
 0x173   :  { %1250 = vmatpush.msrb.mxu1 %v1073_v53  ;;  %v2648_v42 = vpop.f32.mrf.mxu2 }
 0x174   :  { %2953 = vst [vmem:[#allocation32_spill] sm:$0xff] %v2648_v42 }
 0x175   :  { %1251 = vmatpush.msrb.mxu1 %v1072_v13  ;;  %v2657_v13 = vpop.f32.mrf.mxu1 }
 0x176   :  { %v645_v1 = vpop.f32.mrf.mxu0 }
 0x177   :  { %1252 = vmatpush.msrb.mxu1 %v1071_v58  ;;  %v1001_v10 = vmul.f32 %v2468_v21, %v645_v1  ;;  %v2659_v58 = vpop.f32.mrf.mxu3  ;;  %v997_v1 = vmul.f32 %v2513_v2, %v2575_v28 }
 0x179   :  { %1253 = vmatpush.msrb.mxu1 %v1070_v22 }
 0x17b   :  { %1254 = vmatpush.msrb.mxu1 %v1069_v56  ;;  %v2661_v22 = vpop.f32.mrf.mxu2  ;;  %v2674_v56 = vld [vmem:[%s2918_s2 + $0x10] sm:$0xf] }
 0x17c   :  { %2954 = vst [vmem:[#allocation33_spill] sm:$0xff] %v2661_v22  ;;  %1122 = vmatmul.f32.gmra.mxu1 %v2674_v56  ;;  %v2964_v22 = vld [vmem:[#allocation21_spill] sm:$0xff] }
 0x17d   :  { %1255 = vmatpush.msrb.mxu1 %v1068_v8  ;;  %v994_v8 = vmul.f32 %v2539_v17, %v2480_v33  ;;  %v2681_v28 = vpop.f32.mrf.mxu1  ;;  %v991_v33 = vmul.f32 %v2564_v61, %v2432_v39  ;;  %v2957_v39 = vld [vmem:[#allocation28_spill] sm:$0xff] }
 0x17e   :  { %v648_v19 = vpop.f32.mrf.mxu0 }
 0x17f   :  { %1256 = vmatpush.msrb.mxu1 %v1067_v43  ;;  %v1002_v38 = vmul.f32 %v2473_v50, %v648_v19  ;;  %v2683_v32 = vpop.f32.mrf.mxu3  ;;  %v992_v19 = vmul.f32 %v2557_v14, %v2446_v55 }
 0x181   :  { %1126 = vmatpush.msrb.mxu2 %v1002_v38 }
 0x183   :  { %1127 = vmatpush.msrb.mxu2 %v1001_v10  ;;  %v2685_v43 = vpop.f32.mrf.mxu2  ;;  %v990_v10 = vmul.f32 %v2573_v54, %v2418_v62 }
 0x184   :  { %1188 = vmatmul.f32.vlgmr.msra.gmra.mxu1 %v2696_v29 }
 0x185   :  { %1128 = vmatpush.msrb.mxu2 %v1000_v30  ;;  %v2955_v30 = vld [vmem:[#allocation12_spill] sm:$0xff] }
 0x186   :  { %v2654_v53 = vpop.f32.mrf.mxu0  ;;  %v989_v55 = vmul.f32 %v2584_v35, %v2955_v30  ;;  %v2960_v30 = vld [vmem:[#allocation20_spill] sm:$0xff] }
 0x187   :  { %1129 = vmatpush.msrb.mxu2 %v999_v23  ;;  %v2956_v23 = vld [vmem:[#allocation10_spill] sm:$0xff] }
 0x189   :  { %1130 = vmatpush.msrb.mxu2 %v998_v16  ;;  %v988_v16 = vmul.f32 %v2957_v39, %v2956_v23  ;;  %v2961_v23 = vld [vmem:[#allocation18_spill] sm:$0xff] }
 0x18b   :  { %1131 = vmatpush.msrb.mxu2 %v997_v1  ;;  %v753_v1 = vpop.f32.mrf.mxu1 }
 0x18d   :  { %1132 = vmatpush.msrb.mxu2 %v996_v63  ;;  %v2705_v63 = vpop.f32.mrf.mxu3 }
 0x18e   :  { %v2669_v4 = vpop.f32.mrf.mxu0 }
 0x18f   :  { %1133 = vmatpush.msrb.mxu2 %v995_v45  ;;  %v2707_v45 = vpop.f32.mrf.mxu2 }
 0x191   :  { %1134 = vmatpush.msrb.mxu2 %v994_v8  ;;  %v2958_v8 = vld [vmem:[#allocation8_spill] sm:$0xff] }
 0x193   :  { %1135 = vmatpush.msrb.mxu2 %v993_v59  ;;  %v987_v59 = vmul.f32 %v2598_v27, %v2958_v8  ;;  %v2962_v8 = vld [vmem:[#allocation16_spill] sm:$0xff]  ;;  %v756_v15 = vpop.f32.mrf.mxu1 }
 0x194   :  { %v1047_v20 = vmul.f32 %v2091_v49, %v2962_v8 }
 0x195   :  { %1136 = vmatpush.msrb.mxu2 %v992_v19  ;;  %v2716_v19 = vld [vmem:[%s2918_s2 + $0x18] sm:$0xf]  ;;  %v930_v31 = vpop.f32.mrf.mxu3 }
 0x196   :  { %v2691_v38 = vpop.f32.mrf.mxu0  ;;  %1191 = vmatmul.f32.gmra.mxu1 %v2716_v19 }
 0x197   :  { %1137 = vmatpush.msrb.mxu2 %v991_v33  ;;  %v2959_v33 = vld [vmem:[#allocation23_spill] sm:$0xff] }
 0x199   :  { %1138 = vmatpush.msrb.mxu2 %v990_v10  ;;  %v1050_v10 = vmul.f32 %v2054_v37, %v2959_v33  ;;  %v2963_v33 = vld [vmem:[#allocation14_spill] sm:$0xff] }
 0x19a   :  { %v1046_v42 = vmul.f32 %v2097_v51, %v2963_v33 }
 0x19b   :  { %1139 = vmatpush.msrb.mxu2 %v989_v55  ;;  %v1049_v55 = vmul.f32 %v2073_v44, %v2960_v30  ;;  %v2965_v44 = vld [vmem:[#allocation13_spill] sm:$0xff]  ;;  %v759_v8 = vpop.f32.mrf.mxu1 }
 0x19c   :  { %v2967_v30 = vld [vmem:[#allocation9_spill] sm:$0xff] }
 0x19d   :  { %1140 = vmatpush.msrb.mxu2 %v988_v16  ;;  %v1048_v16 = vmul.f32 %v2082_v47, %v2961_v23  ;;  %v1045_v47 = vmul.f32 %v2121_v0, %v2965_v44  ;;  %v2969_v0 = vld [vmem:[#allocation6_spill] sm:$0xff] }
 0x19e   :  { %v2711_v62 = vpop.f32.mrf.mxu0  ;;  %1257 = vmatmul.f32.vlgmr.msrb.gmra.mxu1 %v2964_v22 }
 0x19f   :  { %1141 = vmatpush.msrb.mxu2 %v987_v59  ;;  %v2728_v59 = vpop.f32.mrf.mxu2 }
 0x1a0   :  { %1142 = vmatmul.f32.vlgmr.msrb.gmra.mxu2 %v2696_v29 }
 0x1a1   :  { %1195 = vmatpush.msra.mxu2 %v1050_v10  ;;  %v2966_v10 = vld [vmem:[#allocation11_spill] sm:$0xff] }
 0x1a2   :  { %v1044_v49 = vmul.f32 %v2130_v3, %v2966_v10  ;;  %v2970_v3 = vld [vmem:[#allocation5_spill] sm:$0xff] }
 0x1a3   :  { %1196 = vmatpush.msra.mxu2 %v1049_v55  ;;  %v1043_v55 = vmul.f32 %v2137_v7, %v2967_v30  ;;  %v1040_v44 = vmul.f32 %v2341_v36, %v2970_v3  ;;  %v1039_v7 = vmul.f32 %v2354_v40, %v759_v8 }
 0x1a5   :  { %1197 = vmatpush.msra.mxu2 %v1048_v16  ;;  %v2968_v16 = vld [vmem:[#allocation7_spill] sm:$0xff] }
 0x1a6   :  { %v663_v37 = vpop.f32.mrf.mxu0  ;;  %v1042_v51 = vmul.f32 %v2310_v26, %v2968_v16  ;;  %1260 = vmatmul.f32.gmra.mxu1 %v2674_v56  ;;  %v1036_v16 = vmul.f32 %v2393_v57, %v2681_v28  ;;  %v1096_v28 = vmul.f32 %v2478_v48, %v930_v31  ;;  %v1005_v31 = vmul.f32 %v2377_v25, %v2691_v38 }
 0x1a7   :  { %1198 = vmatpush.msra.mxu2 %v1047_v20  ;;  %v933_v20 = vpop.f32.mrf.mxu3  ;;  %v2743_v33 = vpop.f32.mrf.mxu2 }
 0x1a8   :  { %1145 = vmatmul.f32.gmra.mxu2 %v2716_v19 }
 0x1a9   :  { %1199 = vmatpush.msra.mxu2 %v1046_v42  ;;  %v1041_v42 = vmul.f32 %v2325_v12, %v2969_v0  ;;  %v1035_v0 = vmul.f32 %v2406_v11, %v2657_v13  ;;  %v1095_v13 = vmul.f32 %v2495_v6, %v2705_v63  ;;  %v2971_v63 = vld [vmem:[#allocation4_spill] sm:$0xff] }
 0x1ab   :  { %1200 = vmatpush.msra.mxu2 %v1045_v47  ;;  %v1038_v47 = vmul.f32 %v2362_v34, %v756_v15  ;;  %v1097_v15 = vmul.f32 %v2468_v21, %v933_v20 }
 0x1ad   :  { %1201 = vmatpush.msra.mxu2 %v1044_v49  ;;  %v1037_v49 = vmul.f32 %v2377_v25, %v753_v1  ;;  %v1090_v25 = vmul.f32 %v2539_v17, %v2618_v60 }
 0x1ae   :  { %v666_v23 = vpop.f32.mrf.mxu0 }
 0x1af   :  { %1202 = vmatpush.msra.mxu2 %v1043_v55  ;;  %v936_v30 = vpop.f32.mrf.mxu3  ;;  %v828_v55 = vpop.f32.mrf.mxu2  ;;  %v1008_v3 = vmul.f32 %v2341_v36, %v666_v23  ;;  %v1093_v36 = vmul.f32 %v2513_v2, %v2659_v58  ;;  %v1003_v58 = vmul.f32 %v2406_v11, %v2654_v53  ;;  %v2973_v53 = vld [vmem:[#allocation26_spill] sm:$0xff] }
 0x1b0   :  { %v1088_v60 = vmul.f32 %v2557_v14, %v2973_v53 }
 0x1b1   :  { %1203 = vmatpush.msra.mxu2 %v1042_v51  ;;  %v1098_v51 = vmul.f32 %v2473_v50, %v936_v30  ;;  %v1059_v30 = vmul.f32 %v2530_v18, %v2707_v45 }
 0x1b3   :  { %1204 = vmatpush.msra.mxu2 %v1041_v42 }
 0x1b5   :  { %1205 = vmatpush.msra.mxu2 %v1040_v44  ;;  %v1006_v44 = vmul.f32 %v2362_v34, %v2711_v62  ;;  %v1091_v34 = vmul.f32 %v2530_v18, %v2632_v41  ;;  %v2972_v41 = vld [vmem:[#allocation3_spill] sm:$0xff]  ;;  %v2974_v62 = vld [vmem:[#allocation24_spill] sm:$0xff]  ;;  %v2982_v18 = vld [vmem:[#allocation30_spill] sm:$0xff] }
 0x1b6   :  { %v669_v10 = vpop.f32.mrf.mxu0  ;;  %v1054_v45 = vmul.f32 %v2573_v54, %v2982_v18 }
 0x1b7   :  { %1206 = vmatpush.msra.mxu2 %v1039_v7  ;;  %v1009_v1 = vmul.f32 %v2325_v12, %v669_v10  ;;  %v831_v20 = vpop.f32.mrf.mxu2  ;;  %v1094_v12 = vmul.f32 %v2505_v5, %v2683_v32  ;;  %v1004_v32 = vmul.f32 %v2393_v57, %v2669_v4  ;;  %v1089_v57 = vmul.f32 %v2548_v9, %v2604_v24 }
 0x1b8   :  { %v1065_v4 = vmul.f32 %v2468_v21, %v2972_v41  ;;  %v1063_v24 = vmul.f32 %v2495_v6, %v831_v20  ;;  %v1062_v21 = vmul.f32 %v2505_v5, %v828_v55  ;;  %v1061_v7 = vmul.f32 %v2513_v2, %v2743_v33  ;;  %v2978_v5 = vld [vmem:[#allocation15_spill] sm:$0xff] }
 0x1b9   :  { %1207 = vmatpush.msra.mxu2 %v1038_v47  ;;  %v2977_v47 = vld [vmem:[#allocation17_spill] sm:$0xff]  ;;  %v1060_v10 = vmul.f32 %v2519_v46, %v2728_v59  ;;  %v1058_v2 = vmul.f32 %v2539_v17, %v2685_v43  ;;  %v2981_v55 = vld [vmem:[#allocation31_spill] sm:$0xff] }
 0x1ba   :  { %v1084_v6 = vmul.f32 %v2957_v39, %v2977_v47  ;;  %v2983_v17 = vld [vmem:[#allocation29_spill] sm:$0xff] }
 0x1bb   :  { %1208 = vmatpush.msra.mxu2 %v1037_v49  ;;  %v1083_v49 = vmul.f32 %v2598_v27, %v2978_v5  ;;  %v1053_v43 = vmul.f32 %v2584_v35, %v2983_v17 }
 0x1bd   :  { %1209 = vmatpush.msra.mxu2 %v1036_v16  ;;  %v1055_v16 = vmul.f32 %v2564_v61, %v2981_v55 }
 0x1be   :  { %v672_v8 = vpop.f32.mrf.mxu0 }
 0x1bf   :  { %v1010_v42 = vmul.f32 %v2310_v26, %v672_v8  ;;  %1210 = vmatpush.msra.mxu2 %v1035_v0  ;;  %v1007_v26 = vmul.f32 %v2354_v40, %v663_v37  ;;  %v1092_v40 = vmul.f32 %v2519_v46, %v2646_v52  ;;  %v834_v38 = vpop.f32.mrf.mxu2  ;;  %v1066_v52 = vmul.f32 %v2473_v50, %v2971_v63  ;;  %v2975_v37 = vld [vmem:[#allocation22_spill] sm:$0xff]  ;;  %v2980_v46 = vld [vmem:[#allocation32_spill] sm:$0xff] }
 0x1c0   :  { %1211 = vmatmul.f32.vlgmr.msra.gmra.mxu2 %v2964_v22  ;;  %v1064_v11 = vmul.f32 %v2478_v48, %v834_v38  ;;  %v1087_v50 = vmul.f32 %v2564_v61, %v2974_v62  ;;  %v2976_v48 = vld [vmem:[#allocation19_spill] sm:$0xff]  ;;  %v1056_v59 = vmul.f32 %v2557_v14, %v2980_v46  ;;  %v2985_v14 = vld [vmem:[#allocation25_spill] sm:$0xff]  ;;  %v1120_v61 = vpop.f32.mrf.mxu1 }
 0x1c1   :  { %1264 = vmatpush.msrb.mxu2 %v1098_v51  ;;  %1157 = vmatpush.msrb.mxu3 %v1010_v42  ;;  %v1085_v23 = vmul.f32 %v2584_v35, %v2976_v48  ;;  %v1051_v0 = vmul.f32 %v2598_v27, %v2985_v14 }
 0x1c3   :  { %1265 = vmatpush.msrb.mxu2 %v1097_v15  ;;  %1158 = vmatpush.msrb.mxu3 %v1009_v1 }
 0x1c5   :  { %1266 = vmatpush.msrb.mxu2 %v1096_v28  ;;  %1159 = vmatpush.msrb.mxu3 %v1008_v3 }
 0x1c7   :  { %1267 = vmatpush.msrb.mxu2 %v1095_v13  ;;  %1160 = vmatpush.msrb.mxu3 %v1007_v26 }
 0x1c8   :  { %1214 = vmatmul.f32.gmra.mxu2 %v2674_v56 }
 0x1c9   :  { %1268 = vmatpush.msrb.mxu2 %v1094_v12  ;;  %1161 = vmatpush.msrb.mxu3 %v1006_v44 }
 0x1cb   :  { %1269 = vmatpush.msrb.mxu2 %v1093_v36  ;;  %1162 = vmatpush.msrb.mxu3 %v1005_v31 }
 0x1cd   :  { %1270 = vmatpush.msrb.mxu2 %v1092_v40  ;;  %1163 = vmatpush.msrb.mxu3 %v1004_v32 }
 0x1cf   :  { %1271 = vmatpush.msrb.mxu2 %v1091_v34  ;;  %1164 = vmatpush.msrb.mxu3 %v1003_v58 }
 0x1d0   :  { %1165 = vmatmul.f32.vlgmr.msrb.gmra.mxu3 %v2964_v22  ;;  %v1086_v22 = vmul.f32 %v2573_v54, %v2975_v37 }
 0x1d1   :  { %1272 = vmatpush.msrb.mxu2 %v1090_v25  ;;  %1218 = vmatpush.msra.mxu3 %v1066_v52 }
 0x1d3   :  { %1273 = vmatpush.msrb.mxu2 %v1089_v57  ;;  %1219 = vmatpush.msra.mxu3 %v1065_v4 }
 0x1d5   :  { %1274 = vmatpush.msrb.mxu2 %v1088_v60  ;;  %1220 = vmatpush.msra.mxu3 %v1064_v11 }
 0x1d7   :  { %1275 = vmatpush.msrb.mxu2 %v1087_v50  ;;  %1221 = vmatpush.msra.mxu3 %v1063_v24 }
 0x1d8   :  { %1168 = vmatmul.f32.gmra.mxu3 %v2674_v56  ;;  %v2979_v56 = vld [vmem:[#allocation33_spill] sm:$0xff] }
 0x1d9   :  { %1276 = vmatpush.msrb.mxu2 %v1086_v22  ;;  %1222 = vmatpush.msra.mxu3 %v1062_v21  ;;  %v1057_v33 = vmul.f32 %v2548_v9, %v2979_v56  ;;  %v2984_v9 = vld [vmem:[#allocation27_spill] sm:$0xff] }
 0x1da   :  { %v1052_v51 = vmul.f32 %v2957_v39, %v2984_v9 }
 0x1db   :  { %1277 = vmatpush.msrb.mxu2 %v1085_v23  ;;  %1223 = vmatpush.msra.mxu3 %v1061_v7 }
 0x1dd   :  { %1278 = vmatpush.msrb.mxu2 %v1084_v6  ;;  %1224 = vmatpush.msra.mxu3 %v1060_v10 }
 0x1df   :  { %1279 = vmatpush.msrb.mxu2 %v1083_v49  ;;  %1225 = vmatpush.msra.mxu3 %v1059_v30 }
 0x1e0   :  { %1280 = vmatmul.f32.vlgmr.msrb.gmra.mxu2 %v2696_v29 }
 0x1e1   :  { %1226 = vmatpush.msra.mxu3 %v1058_v2 }
 0x1e3   :  { %1227 = vmatpush.msra.mxu3 %v1057_v33 }
 0x1e5   :  { %1228 = vmatpush.msra.mxu3 %v1056_v59 }
 0x1e7   :  { %1229 = vmatpush.msra.mxu3 %v1055_v16 }
 0x1e8   :  { %1283 = vmatmul.f32.gmra.mxu2 %v2716_v19 }
 0x1e9   :  { %1230 = vmatpush.msra.mxu3 %v1054_v45 }
 0x1eb   :  { %1231 = vmatpush.msra.mxu3 %v1053_v43 }
 0x1ed   :  { %1232 = vmatpush.msra.mxu3 %v1052_v51 }
 0x1ef   :  { %1233 = vmatpush.msra.mxu3 %v1051_v0 }
 0x1f0   :  { %1234 = vmatmul.f32.vlgmr.msra.gmra.mxu3 %v2696_v29 }
 0x1f8   :  { %1237 = vmatmul.f32.gmra.mxu3 %v2716_v19 }
 0x1f9   :  { %v1123_v8 = vpop.f32.mrf.mxu1 }
 0x201   :  { %v1189_v27 = vpop.f32.mrf.mxu1 }
 0x213   :  { %v1192_v13 = vpop.f32.mrf.mxu1 }
 0x21b   :  { %v1258_v36 = vpop.f32.mrf.mxu1 }
 0x223   :  { %v1143_v54 = vpop.f32.mrf.mxu2  ;;  %v1261_v34 = vpop.f32.mrf.mxu1 }
 0x224   :  { %v1144_v15 = vadd.f32 %v1143_v54, %v1120_v61 }
 0x226   :  { %v1288_v35 = vsel %vm1287_vm1, %v1144_v15, -inf }
 0x227   :  { %1289 = vmax.xlane.f32.xlu0 %v1288_v35 }
 0x22b   :  { %v1146_v42 = vpop.f32.mrf.mxu2 }
 0x22c   :  { %v1147_v39 = vadd.f32 %v1146_v42, %v1123_v8 }
 0x22e   :  { %v1292_v1 = vsel %vm1291_vm2, %v1147_v39, -inf }
 0x22f   :  { %1293 = vmax.xlane.f32.xlu0 %v1292_v1 }
 0x243   :  { %v1212_v28 = vpop.f32.mrf.mxu2 }
 0x24b   :  { %v1215_v20 = vpop.f32.mrf.mxu2 }
 0x253   :  { %v1166_v3 = vpop.f32.mrf.mxu3 }
 0x254   :  { %v1190_v29 = vadd.f32 %v1189_v27, %v1166_v3 }
 0x256   :  { %v1295_v19 = vsel %vm1287_vm1, %v1190_v29, -inf }
 0x257   :  { %1296 = vmax.xlane.f32.xlu1 %v1295_v19 }
 0x25b   :  { %v1169_v26 = vpop.f32.mrf.mxu3 }
 0x25c   :  { %v1193_v12 = vadd.f32 %v1192_v13, %v1169_v26 }
 0x25e   :  { %v1298_v44 = vsel %vm1291_vm2, %v1193_v12, -inf }
 0x25f   :  { %1299 = vmax.xlane.f32.xlu1 %v1298_v44 }
 0x263   :  { %v1281_v31 = vpop.f32.mrf.mxu2 }
 0x264   :  { %v1282_v40 = vadd.f32 %v1281_v31, %v1258_v36 }
 0x266   :  { %v1307_v32 = vsel %vm1287_vm1, %v1282_v40, -inf }
 0x267   :  { %1308 = vmax.xlane.f32.xlu0 %v1307_v32 }
 0x26b   :  { %v1284_v58 = vpop.f32.mrf.mxu2 }
 0x26c   :  { %v1285_v25 = vadd.f32 %v1284_v58, %v1261_v34 }
 0x26e   :  { %v1310_v38 = vsel %vm1291_vm2, %v1285_v25, -inf }
 0x26f   :  { %1311 = vmax.xlane.f32.xlu1 %v1310_v38 }
 0x273   :  { %v1235_v63 = vpop.f32.mrf.mxu3 }
 0x274   :  { %v1236_v52 = vadd.f32 %v1235_v63, %v1212_v28 }
 0x276   :  { %v1301_v57 = vsel %vm1287_vm1, %v1236_v52, -inf }
 0x277   :  { %1302 = vmax.xlane.f32.xlu2 %v1301_v57 }
 0x27b   :  { %v1238_v41 = vpop.f32.mrf.mxu3 }
 0x27c   :  { %v1239_v4 = vadd.f32 %v1238_v41, %v1215_v20 }
 0x27e   :  { %v1304_v11 = vsel %vm1291_vm2, %v1239_v4, -inf }
 0x27f   :  { %1305 = vmax.xlane.f32.xlu2 %v1304_v11 }
 0x29a   :  { %v1290_v53 = vpop.xlane.xlu0 %1289 }
 0x29b   :  { %v1313_v60 = vsub.f32 %v1144_v15, %v1290_v53 }
 0x29d   :  { %v1321_v62 = vmul.f32 1.442695, %v1313_v60 }
 0x29f   :  { %1633 = vpow2.f32 %v1321_v62 }
 0x2a2   :  { %v1294_v50 = vpop.xlane.xlu0 %1293 }
 0x2a3   :  { %v1314_v24 = vsub.f32 %v1147_v39, %v1294_v50 }
 0x2a5   :  { %v2842_v37 = vpop.eup %1633  ;;  %v1323_v22 = vmul.f32 1.442695, %v1314_v24 }
 0x2a6   :  { %v1337_v21 = vsel %vm1287_vm1, %v2842_v37, 0.0 }
 0x2a7   :  { %1635 = vpow2.f32 %v1323_v22  ;;  %1338 = vadd.xlane.f32.xlu2 %v1337_v21 }
 0x2ad   :  { %v2846_v48 = vpop.eup %1635 }
 0x2ae   :  { %v1340_v23 = vsel %vm1291_vm2, %v2846_v48, 0.0 }
 0x2af   :  { %1341 = vadd.xlane.f32.xlu0 %v1340_v23 }
 0x2ca   :  { %v1297_v7 = vpop.xlane.xlu1 %1296 }
 0x2cb   :  { %v1315_v47 = vsub.f32 %v1190_v29, %v1297_v7 }
 0x2cd   :  { %v1325_v6 = vmul.f32 1.442695, %v1315_v47 }
 0x2cf   :  { %1637 = vpow2.f32 %v1325_v6 }
 0x2d2   :  { %v1300_v10 = vpop.xlane.xlu1 %1299 }
 0x2d3   :  { %v1316_v5 = vsub.f32 %v1193_v12, %v1300_v10 }
 0x2d5   :  { %v2850_v49 = vpop.eup %1637  ;;  %v1327_v30 = vmul.f32 1.442695, %v1316_v5 }
 0x2d6   :  { %v1343_v2 = vsel %vm1287_vm1, %v2850_v49, 0.0 }
 0x2d7   :  { %1639 = vpow2.f32 %v1327_v30  ;;  %1344 = vadd.xlane.f32.xlu1 %v1343_v2 }
 0x2da   :  { %v1309_v56 = vpop.xlane.xlu0 %1308 }
 0x2db   :  { %v1319_v33 = vsub.f32 %v1282_v40, %v1309_v56 }
 0x2dd   :  { %v1333_v46 = vmul.f32 1.442695, %v1319_v33  ;;  %v2854_v59 = vpop.eup %1639 }
 0x2de   :  { %v1346_v55 = vsel %vm1291_vm2, %v2854_v59, 0.0 }
 0x2df   :  { %1641 = vpow2.f32 %v1333_v46  ;;  %1347 = vadd.xlane.f32.xlu2 %v1346_v55 }
 0x2e2   :  { %v1312_v17 = vpop.xlane.xlu1 %1311 }
 0x2e3   :  { %v1320_v51 = vsub.f32 %v1285_v25, %v1312_v17 }
 0x2e5   :  { %v2858_v16 = vpop.eup %1641  ;;  %v1335_v14 = vmul.f32 1.442695, %v1320_v51 }
 0x2e6   :  { %v1355_v18 = vsel %vm1287_vm1, %v2858_v16, 0.0 }
 0x2e7   :  { %1356 = vadd.xlane.f32.xlu2 %v1355_v18 }
 0x2ea   :  { %v1303_v45 = vpop.xlane.xlu2 %1302 }
 0x2eb   :  { %v1317_v43 = vsub.f32 %v1236_v52, %v1303_v45 }
 0x2ed   :  { %v1329_v9 = vmul.f32 1.442695, %v1317_v43 }
 0x2ef   :  { %1643 = vpow2.f32 %v1329_v9 }
 0x2f0   :  { %1645 = vpow2.f32 %v1335_v14 }
 0x2f2   :  { %v1306_v0 = vpop.xlane.xlu2 %1305 }
 0x2f3   :  { %v1318_v61 = vsub.f32 %v1239_v4, %v1306_v0 }
 0x2f5   :  { %v2862_v54 = vpop.eup %1643  ;;  %v1331_v15 = vmul.f32 1.442695, %v1318_v61 }
 0x2f6   :  { %v1349_v35 = vsel %vm1287_vm1, %v2862_v54, 0.0  ;;  %v2866_v8 = vpop.eup %1645 }
 0x2f7   :  { %1647 = vpow2.f32 %v1331_v15  ;;  %1350 = vadd.xlane.f32.xlu0 %v1349_v35  ;;  %v1358_v1 = vsel %vm1291_vm2, %v2866_v8, 0.0 }
 0x2fd   :  { %v2868_v42 = vpop.eup %1647 }
 0x2fe   :  { %v1352_v39 = vsel %vm1291_vm2, %v2868_v42, 0.0 }
 0x2ff   :  { %1353 = vadd.xlane.f32.xlu1 %v1352_v39  ;;  %1359 = vadd.xlane.f32.xlu0 %v1358_v1 }
 0x31a   :  { %v1339_v27 = vpop.xlane.xlu2 %1338 }
 0x31b   :  { %1649 = vrcp.f32 %v1339_v27  ;;  %v1372_v19 = vand.u32 2147483648, %v1339_v27  ;;  %v1370_v26 = vand.u32 2147483647, %v1339_v27  ;;  %vm1366_vm4 = vweird.f32 %v1339_v27 }
 0x31d   :  { %v1373_v36 = vor.u32 1.1754944e-38, %v1372_v19  ;;  %vm1371_vm6 = vcmp.eq.f32.partialorder %v1370_v26, 8.507059e+37 }
 0x321   :  { %v1650_v28 = vpop.eup %1649 }
 0x322   :  { %v1362_v3 = vmul.f32 %v1650_v28, %v1339_v27  ;;  %v1342_v29 = vpop.xlane.xlu0 %1341  ;;  %vm1367_vm3 = vweird.f32 %v1650_v28 }
 0x323   :  { %1651 = vrcp.f32 %v1342_v29  ;;  %vm1368_vm5 = vmor %vm1366_vm4, %vm1367_vm3  ;;  %v1387_v25 = vand.u32 2147483648, %v1342_v29  ;;  %v1385_v63 = vand.u32 2147483647, %v1342_v29  ;;  %vm1381_vm8 = vweird.f32 %v1342_v29 }
 0x324   :  { %v1363_v13 = vsub.f32 1.0, %v1362_v3 }
 0x325   :  { %v1388_v57 = vor.u32 1.1754944e-38, %v1387_v25  ;;  %vm1386_vm10 = vcmp.eq.f32.partialorder %v1385_v63, 8.507059e+37 }
 0x326   :  { %v1364_v20 = vmul.f32 %v1650_v28, %v1363_v13 }
 0x328   :  { %v1365_v12 = vadd.f32 %v1650_v28, %v1364_v20 }
 0x329   :  { %v1652_v44 = vpop.eup %1651 }
 0x32a   :  { %v1369_v31 = vsel %vm1368_vm5, %v1650_v28, %v1365_v12  ;;  %v1377_v40 = vmul.f32 %v1652_v44, %v1342_v29  ;;  %vm1382_vm7 = vweird.f32 %v1652_v44 }
 0x32b   :  { %v1374_v32 = vsel %vm1371_vm6, %v1373_v36, %v1369_v31  ;;  %vm1383_vm9 = vmor %vm1381_vm8, %vm1382_vm7 }
 0x32c   :  { %v1375_v34 = vmul.f32 %v2842_v37, %v1374_v32  ;;  %v1378_v58 = vsub.f32 1.0, %v1377_v40 }
 0x32e   :  { %1481 = vst.msk [vmem:[%s2919_s5] sm:$0xff] %vm1287_vm1, %v1375_v34  ;;  %v1379_v38 = vmul.f32 %v1652_v44, %v1378_v58 }
 0x330   :  { %v1380_v52 = vadd.f32 %v1652_v44, %v1379_v38 }
 0x332   :  { %v1384_v41 = vsel %vm1383_vm9, %v1652_v44, %v1380_v52 }
 0x333   :  { %v1389_v4 = vsel %vm1386_vm10, %v1388_v57, %v1384_v41 }
 0x334   :  { %v1390_v11 = vmul.f32 %v2846_v48, %v1389_v4 }
 0x336   :  { %1482 = vst.msk [vmem:[%s2919_s5 + $0x8] sm:$0xf] %vm1291_vm2, %v1390_v11 }
 0x34a   :  { %v1345_v53 = vpop.xlane.xlu1 %1344 }
 0x34b   :  { %1653 = vrcp.f32 %v1345_v53  ;;  %v1402_v37 = vand.u32 2147483648, %v1345_v53  ;;  %v1400_v21 = vand.u32 2147483647, %v1345_v53  ;;  %vm1396_vm12 = vweird.f32 %v1345_v53 }
 0x34d   :  { %v1403_v48 = vor.u32 1.1754944e-38, %v1402_v37  ;;  %vm1401_vm14 = vcmp.eq.f32.partialorder %v1400_v21, 8.507059e+37 }
 0x351   :  { %v1654_v60 = vpop.eup %1653 }
 0x352   :  { %v1392_v62 = vmul.f32 %v1654_v60, %v1345_v53  ;;  %v1348_v50 = vpop.xlane.xlu2 %1347  ;;  %vm1397_vm11 = vweird.f32 %v1654_v60 }
 0x353   :  { %1655 = vrcp.f32 %v1348_v50  ;;  %vm1398_vm13 = vmor %vm1396_vm12, %vm1397_vm11  ;;  %v1417_v56 = vand.u32 2147483648, %v1348_v50  ;;  %v1415_v46 = vand.u32 2147483647, %v1348_v50  ;;  %vm1411_vm0 = vweird.f32 %v1348_v50 }
 0x354   :  { %v1393_v24 = vsub.f32 1.0, %v1392_v62 }
 0x355   :  { %v1418_v45 = vor.u32 1.1754944e-38, %v1417_v56  ;;  %vm1416_vm4 = vcmp.eq.f32.partialorder %v1415_v46, 8.507059e+37 }
 0x356   :  { %v1394_v22 = vmul.f32 %v1654_v60, %v1393_v24 }
 0x358   :  { %v1395_v23 = vadd.f32 %v1654_v60, %v1394_v22 }
 0x359   :  { %v1656_v7 = vpop.eup %1655 }
 0x35a   :  { %v1399_v47 = vsel %vm1398_vm13, %v1654_v60, %v1395_v23  ;;  %v1407_v6 = vmul.f32 %v1656_v7, %v1348_v50  ;;  %v1357_v10 = vpop.xlane.xlu2 %1356  ;;  %vm1412_vm15 = vweird.f32 %v1656_v7 }
 0x35b   :  { %v1404_v5 = vsel %vm1401_vm14, %v1403_v48, %v1399_v47  ;;  %1657 = vrcp.f32 %v1357_v10  ;;  %vm1413_vm3 = vmor %vm1411_vm0, %vm1412_vm15  ;;  %v1462_v14 = vand.u32 2147483648, %v1357_v10  ;;  %v1460_v61 = vand.u32 2147483647, %v1357_v10 }
 0x35c   :  { %v1405_v30 = vmul.f32 %v2850_v49, %v1404_v5  ;;  %v1408_v2 = vsub.f32 1.0, %v1407_v6  ;;  %vm1456_vm6 = vweird.f32 %v1357_v10 }
 0x35d   :  { %v1463_v35 = vor.u32 1.1754944e-38, %v1462_v14  ;;  %vm1461_vm8 = vcmp.eq.f32.partialorder %v1460_v61, 8.507059e+37 }
 0x35e   :  { %1483 = vst.msk [vmem:[%s2919_s5 + $0x10] sm:$0xff] %vm1287_vm1, %v1405_v30  ;;  %v1409_v33 = vmul.f32 %v1656_v7, %v1408_v2 }
 0x360   :  { %v1410_v55 = vadd.f32 %v1656_v7, %v1409_v33 }
 0x361   :  { %v1658_v18 = vpop.eup %1657 }
 0x362   :  { %v1414_v17 = vsel %vm1413_vm3, %v1656_v7, %v1410_v55  ;;  %v1452_v43 = vmul.f32 %v1658_v18, %v1357_v10  ;;  %vm1457_vm5 = vweird.f32 %v1658_v18 }
 0x363   :  { %v1419_v9 = vsel %vm1416_vm4, %v1418_v45, %v1414_v17  ;;  %vm1458_vm7 = vmor %vm1456_vm6, %vm1457_vm5 }
 0x364   :  { %v1420_v49 = vmul.f32 %v2854_v59, %v1419_v9  ;;  %v1453_v51 = vsub.f32 1.0, %v1452_v43 }
 0x366   :  { %1484 = vst.msk [vmem:[%s2919_s5 + $0x18] sm:$0xf] %vm1291_vm2, %v1420_v49  ;;  %v1454_v0 = vmul.f32 %v1658_v18, %v1453_v51 }
 0x368   :  { %v1455_v15 = vadd.f32 %v1658_v18, %v1454_v0 }
 0x36a   :  { %v1459_v39 = vsel %vm1458_vm7, %v1658_v18, %v1455_v15  ;;  %v1351_v1 = vpop.xlane.xlu0 %1350 }
 0x36b   :  { %v1464_v27 = vsel %vm1461_vm8, %v1463_v35, %v1459_v39  ;;  %1659 = vrcp.f32 %v1351_v1  ;;  %v1432_v20 = vand.u32 2147483648, %v1351_v1  ;;  %v1430_v12 = vand.u32 2147483647, %v1351_v1 }
 0x36c   :  { %v1465_v59 = vmul.f32 %v2858_v16, %v1464_v27  ;;  %vm1426_vm10 = vweird.f32 %v1351_v1 }
 0x36d   :  { %v1433_v16 = vor.u32 1.1754944e-38, %v1432_v20  ;;  %vm1431_vm12 = vcmp.eq.f32.partialorder %v1430_v12, 8.507059e+37 }
 0x36e   :  { %1487 = vst.msk [vmem:[%s2919_s5 + $0x30] sm:$0xff] %vm1287_vm1, %v1465_v59 }
 0x371   :  { %v1660_v28 = vpop.eup %1659 }
 0x372   :  { %v1422_v3 = vmul.f32 %v1660_v28, %v1351_v1  ;;  %v1360_v29 = vpop.xlane.xlu0 %1359  ;;  %v1354_v13 = vpop.xlane.xlu1 %1353  ;;  %vm1427_vm9 = vweird.f32 %v1660_v28 }
 0x373   :  { %1661 = vrcp.f32 %v1360_v29  ;;  %vm1428_vm11 = vmor %vm1426_vm10, %vm1427_vm9  ;;  %v1477_v63 = vand.u32 2147483648, %v1360_v29  ;;  %v1475_v41 = vand.u32 2147483647, %v1360_v29  ;;  %v1447_v4 = vand.u32 2147483648, %v1354_v13 }
 0x374   :  { %v1423_v19 = vsub.f32 1.0, %v1422_v3  ;;  %1663 = vrcp.f32 %v1354_v13  ;;  %v1445_v53 = vand.u32 2147483647, %v1354_v13  ;;  %vm1471_vm15 = vweird.f32 %v1360_v29 }
 0x375   :  { %v1478_v62 = vor.u32 1.1754944e-38, %v1477_v63  ;;  %vm1441_vm3 = vweird.f32 %v1354_v13  ;;  %vm1476_vm4 = vcmp.eq.f32.partialorder %v1475_v41, 8.507059e+37  ;;  %v1448_v24 = vor.u32 1.1754944e-38, %v1447_v4 }
 0x376   :  { %v1424_v26 = vmul.f32 %v1660_v28, %v1423_v19 }
 0x378   :  { %v1425_v44 = vadd.f32 %v1660_v28, %v1424_v26 }
 0x379   :  { %v1662_v36 = vpop.eup %1661 }
 0x37a   :  { %v1664_v31 = vpop.eup %1663  ;;  %v1429_v40 = vsel %vm1428_vm11, %v1660_v28, %v1425_v44  ;;  %v1467_v32 = vmul.f32 %v1662_v36, %v1360_v29  ;;  %vm1472_vm13 = vweird.f32 %v1662_v36 }
 0x37b   :  { %v1434_v34 = vsel %vm1431_vm12, %v1433_v16, %v1429_v40  ;;  %v1437_v58 = vmul.f32 %v1664_v31, %v1354_v13  ;;  %vm1442_vm14 = vweird.f32 %v1664_v31  ;;  %vm1473_vm0 = vmor %vm1471_vm15, %vm1472_vm13 }
 0x37c   :  { %v1435_v25 = vmul.f32 %v2862_v54, %v1434_v34  ;;  %v1468_v38 = vsub.f32 1.0, %v1467_v32  ;;  %vm1443_vm5 = vmor %vm1441_vm3, %vm1442_vm14 }
 0x37d   :  { %v1438_v52 = vsub.f32 1.0, %v1437_v58 }
 0x37e   :  { %1485 = vst.msk [vmem:[%s2919_s5 + $0x20] sm:$0xff] %vm1287_vm1, %v1435_v25  ;;  %v1469_v57 = vmul.f32 %v1662_v36, %v1468_v38  ;;  %vm1446_vm1 = vcmp.eq.f32.partialorder %v1445_v53, 8.507059e+37 }
 0x37f   :  { %v1439_v11 = vmul.f32 %v1664_v31, %v1438_v52 }
 0x380   :  { %v1470_v60 = vadd.f32 %v1662_v36, %v1469_v57 }
 0x381   :  { %v1440_v54 = vadd.f32 %v1664_v31, %v1439_v11 }
 0x382   :  { %v1474_v50 = vsel %vm1473_vm0, %v1662_v36, %v1470_v60 }
 0x383   :  { %v1479_v37 = vsel %vm1476_vm4, %v1478_v62, %v1474_v50  ;;  %v1444_v22 = vsel %vm1443_vm5, %v1664_v31, %v1440_v54 }
 0x384   :  { %v1480_v21 = vmul.f32 %v2866_v8, %v1479_v37  ;;  %v1449_v23 = vsel %vm1446_vm1, %v1448_v24, %v1444_v22 }
 0x385   :  { %v1450_v7 = vmul.f32 %v2868_v42, %v1449_v23 }
 0x386   :  { %1488 = vst.msk [vmem:[%s2919_s5 + $0x38] sm:$0xf] %vm1291_vm2, %v1480_v21 }
 0x387   :  { %1486 = vst.msk [vmem:[%s2919_s5 + $0x28] sm:$0xf] %vm1291_vm2, %v1450_v7 }

</bundles_post_ra>
